<compile_context>
chip_gen: v7x
topology: tpu7x:2x2x1
jax: 0.10.0
libtpu: 0.0.40
codegen_flags: <defaults>
</compile_context>

<pallas_src>
import functools

import numpy as np
import jax
import jax.numpy as jnp
from jax.experimental import pallas as pl
from jax.experimental.pallas import tpu as pltpu


_VMEM_LIMIT = 32 * 1024 * 1024


def _round_up(x, m):
    return (x + m - 1) // m * m


def _cdiv(a, b):
    return (a + b - 1) // b


# ---------------------------------------------------------------------------
# Tile planning helpers (static Python ints)
# ---------------------------------------------------------------------------
def _plan_m(M):
    """GEMM row tile.  Partial last tile is handled by masked writes."""
    if M < 128:
        return _round_up(max(M, 1), 8)
    for t in (1024, 512, 256, 128):
        if (_cdiv(M, t) * t - M) * 4 <= M:          # <=25% MXU waste on last tile
            return t
    return 128


def _plan_n(N):
    """Returns (tn, Np).  Prefer 512/256 tiles (256-wide MXU on v6e/v7x)."""
    Np = _round_up(N, 128)
    if Np <= 640:
        return Np, Np
    for t in (512, 256, 384, 128):
        if Np % t == 0:
            return t, Np
    return 128, Np


def _plan_tk(Kp):
    """Keep a k grid axis for K>=1024 so weight DMA overlaps MXU work."""
    if Kp < 1024 or Kp % 128 != 0:
        return Kp
    for t in (512, 256, 384, 128):
        if Kp % t == 0:
            return t
    return Kp


def _plan_tap_tm(Mb):
    if Mb <= 1024:
        return _round_up(Mb, 8)
    if Mb <= 8192:
        return 512
    return 1024


# ---------------------------------------------------------------------------
# Pallas kernel 1: tiled bf16 GEMM with fused f32 (folded-BN) scale/bias + ReLU
# ---------------------------------------------------------------------------
def _matmul_bn_act_kernel(x_ref, w_ref, s_ref, b_ref, o_ref, acc_ref, *, relu):
    @pl.when(pl.program_id(2) == 0)
    def _():
        acc_ref[...] = jnp.zeros_like(acc_ref)

    acc_ref[...] += jnp.dot(x_ref[...], w_ref[...],
                            preferred_element_type=jnp.float32)

    @pl.when(pl.program_id(2) == pl.num_programs(2) - 1)
    def _():
        y = acc_ref[...] * s_ref[...] + b_ref[...]
        if relu:
            y = jnp.maximum(y, 0.0)
        o_ref[...] = y.astype(o_ref.dtype)


@functools.partial(jax.jit, static_argnames=("n_valid", "relu", "out_dtype"))
def fused_matmul(x, w, scale, bias, *, n_valid, relu, out_dtype):
    """y = act((x @ w) * scale + bias), output shape (M, n_valid).

    `w`/`scale`/`bias` arrive pre-padded to (Kp, Np)/(1, Np) and w is bfloat16.
    Ragged last M tile and padded output channels are handled by Pallas partial
    blocks (masked writes) -- no activation padding / output slicing copies.
    """
    M, K = x.shape
    Kw, Np = w.shape
    assert K == Kw, (K, Kw)

    tm = _plan_m(M)
    tn, _ = _plan_n(Np)
    tk = _plan_tk(K)
    x = x.astype(jnp.bfloat16)

    grid = (_cdiv(M, tm), Np // tn, K // tk)
    return pl.pallas_call(
        functools.partial(_matmul_bn_act_kernel, relu=relu),
        out_shape=jax.ShapeDtypeStruct((M, n_valid), out_dtype),
        grid_spec=pltpu.PrefetchScalarGridSpec(
            num_scalar_prefetch=0,
            grid=grid,
            in_specs=[
                pl.BlockSpec((tm, tk), lambda i, j, k: (i, k)),
                pl.BlockSpec((tk, tn), lambda i, j, k: (k, j)),
                pl.BlockSpec((1, tn), lambda i, j, k: (0, j)),
                pl.BlockSpec((1, tn), lambda i, j, k: (0, j)),
            ],
            out_specs=pl.BlockSpec((tm, tn), lambda i, j, k: (i, j)),
            scratch_shapes=[pltpu.VMEM((tm, tn), jnp.float32)],
        ),
        compiler_params=pltpu.CompilerParams(
            dimension_semantics=("parallel", "parallel", "arbitrary"),
            vmem_limit_bytes=_VMEM_LIMIT),
    )(x, w, scale, bias)


# ---------------------------------------------------------------------------
# Pallas kernel 2: stride-1 conv as "tap" kernel -- im2col built in VMEM.
#
# The activation is spatially padded, flattened to (B, Lp, C) rows, and the
# kernel DMAs one contiguous row-window per output tile.  Tap t = (i, j) is the
# static VMEM view window[i*Wp + j : i*Wp + j + tm, :]; the kh*kw views are
# packed side by side into an im2col block in VMEM and fed to a single GEMM.
# Output rows are laid out with width Wp (the kw-1 "wrap" columns are garbage
# and dropped by the caller).
# ---------------------------------------------------------------------------
def _conv_tap_kernel(x_hbm, w_ref, s_ref, b_ref, o_ref, xwin, xcol, sem, *,
                     tap_offsets, win_rows, tm, cin, relu):
    b = pl.program_id(0)
    m = pl.program_id(1)
    row0 = m * tm

    cp = pltpu.make_async_copy(
        x_hbm.at[b, pl.ds(row0, win_rows), :], xwin, sem)
    cp.start()
    cp.wait()

    for t, off in enumerate(tap_offsets):            # static Python unroll
        xcol[:, t * cin:(t + 1) * cin] = xwin[off:off + tm, :]

    y = jnp.dot(xcol[...], w_ref[...], preferred_element_type=jnp.float32)
    y = y * s_ref[...] + b_ref[...]
    if relu:
        y = jnp.maximum(y, 0.0)
    o_ref[...] = y.astype(o_ref.dtype)


@functools.partial(jax.jit, static_argnames=(
    "tap_offsets", "win_rows", "tm", "cin", "mb", "n_valid", "relu"))
def _tap_matmul(xf, w, scale, bias, *, tap_offsets, win_rows, tm, cin, mb,
                n_valid, relu):
    B = xf.shape[0]
    K, Np = w.shape
    mt = _cdiv(mb, tm)
    kernel = functools.partial(
        _conv_tap_kernel, tap_offsets=tap_offsets, win_rows=win_rows,
        tm=tm, cin=cin, relu=relu)
    return pl.pallas_call(
        kernel,
        out_shape=jax.ShapeDtypeStruct((B, mb, n_valid), jnp.bfloat16),
        grid_spec=pltpu.PrefetchScalarGridSpec(
            num_scalar_prefetch=0,
            grid=(B, mt),
            in_specs=[
                pl.BlockSpec(memory_space=pl.ANY),               # flat activation
                pl.BlockSpec((K, Np), lambda b, m: (0, 0)),       # weights (resident)
                pl.BlockSpec((1, Np), lambda b, m: (0, 0)),       # BN scale
                pl.BlockSpec((1, Np), lambda b, m: (0, 0)),       # BN bias
            ],
            out_specs=pl.BlockSpec((None, tm, Np), lambda b, m: (b, m, 0)),
            scratch_shapes=[
                pltpu.VMEM((win_rows, cin), jnp.bfloat16),        # row window
                pltpu.VMEM((tm, K), jnp.bfloat16),                # im2col block
                pltpu.SemaphoreType.DMA,
            ],
        ),
        compiler_params=pltpu.CompilerParams(
            dimension_semantics=("parallel", "arbitrary"),
            vmem_limit_bytes=_VMEM_LIMIT),
    )(xf, w, scale, bias)


def _conv_tap(x, p, padding):
    kh, kw = p["ksize"]
    ph, pw = padding
    B, H, W, C = x.shape
    assert p["w"].shape[0] == kh * kw * C, (p["w"].shape, kh, kw, C)
    Hp, Wp = H + 2 * ph, W + 2 * pw
    Ho, Wo = Hp - kh + 1, Wp - kw + 1
    Mb = Ho * Wp                                   # output rows per batch (wide)
    tm = _plan_tap_tm(Mb)
    mt = _cdiv(Mb, tm)
    D = (kh - 1) * Wp + (kw - 1)                   # max tap offset (rows)
    Dr = _round_up(max(D, 8), 8)
    win_rows = tm + Dr
    Lp = mt * tm + Dr                              # always >= Hp*Wp

    xp = x
    if ph or pw:
        xp = jnp.pad(xp, ((0, 0), (ph, ph), (pw, pw), (0, 0)))
    xf = xp.reshape(B, Hp * Wp, C)
    if Lp > Hp * Wp:
        xf = jnp.pad(xf, ((0, 0), (0, Lp - Hp * Wp), (0, 0)))

    tap_offsets = tuple(i * Wp + j for i in range(kh) for j in range(kw))
    y = _tap_matmul(xf, p["w"], p["scale"], p["bias"],
                    tap_offsets=tap_offsets, win_rows=win_rows, tm=tm,
                    cin=C, mb=Mb, n_valid=p["n"], relu=True)
    # (B, Ho*Wp, n) -> (B, Ho, Wp, n), drop the kw-1 garbage columns.
    return y.reshape(B, Ho, Wp, p["n"])[:, :, :Wo, :]


# ---------------------------------------------------------------------------
# Pallas kernel 3: global spatial mean pool  (B, H*W, C) bf16 -> (B, C) f32
# ---------------------------------------------------------------------------
def _gap_kernel(x_ref, o_ref, *, inv_hw):
    o_ref[...] = jnp.sum(x_ref[...].astype(jnp.float32), axis=1) * inv_hw


@jax.jit
def global_avg_pool(x_bhwc):
    B, H, W, C = x_bhwc.shape
    x = x_bhwc.reshape(B, H * W, C)
    ct = C
    for t in (1024, 512, 256, 128):
        if C % t == 0 and C // t >= 2:             # >=2 steps (v7x megacore)
            ct = t
            break
    return pl.pallas_call(
        functools.partial(_gap_kernel, inv_hw=1.0 / float(H * W)),
        out_shape=jax.ShapeDtypeStruct((B, C), jnp.float32),
        grid_spec=pltpu.PrefetchScalarGridSpec(
            num_scalar_prefetch=0,
            grid=(C // ct,),
            in_specs=[pl.BlockSpec((B, H * W, ct), lambda c: (0, 0, c))],
            out_specs=pl.BlockSpec((B, ct), lambda c: (0, c)),
        ),
        compiler_params=pltpu.CompilerParams(
            dimension_semantics=("parallel",),
            vmem_limit_bytes=_VMEM_LIMIT),
    )(x)


# ---------------------------------------------------------------------------
# Plain-JAX glue: im2col (stride-2 convs only), pooling, bilinear resize
# ---------------------------------------------------------------------------
def _im2col(x, kh, kw, sh, sw, ph, pw, k_out):
    # x: (B, H, W, C) -> patches (B*Ho*Wo, k_out); feature order = (kh, kw, c),
    # zero-padded on the right to k_out columns (folded into the concat).
    B, H, W, C = x.shape
    if ph or pw:
        x = jnp.pad(x, ((0, 0), (ph, ph), (pw, pw), (0, 0)))
    Ho = (H + 2 * ph - kh) // sh + 1
    Wo = (W + 2 * pw - kw) // sw + 1
    if kh == 1 and kw == 1 and sh == 1 and sw == 1 and k_out == C:
        return x.reshape(B * Ho * Wo, C), Ho, Wo
    taps = [x[:, i:i + sh * (Ho - 1) + 1:sh, j:j + sw * (Wo - 1) + 1:sw, :]
            for i in range(kh) for j in range(kw)]
    if k_out > kh * kw * C:
        taps.append(jnp.zeros((B, Ho, Wo, k_out - kh * kw * C), x.dtype))
    patches = jnp.concatenate(taps, axis=-1) if len(taps) > 1 else taps[0]
    return patches.reshape(B * Ho * Wo, k_out), Ho, Wo


def conv_bn_relu(x, p, stride=(1, 1), padding=(0, 0)):
    if p["mode"] == "tap":                          # stride-1 spatial conv
        return _conv_tap(x, p, padding)
    kh, kw = p["ksize"]
    B, H, W, C = x.shape
    if kh == 1 and kw == 1 and stride == (1, 1) and padding == (0, 0):
        y = fused_matmul(x.reshape(B * H * W, C), p["w"], p["scale"], p["bias"],
                         n_valid=p["n"], relu=True, out_dtype=jnp.bfloat16)
        return y.reshape(B, H, W, p["n"])
    patches, Ho, Wo = _im2col(x, kh, kw, stride[0], stride[1],
                              padding[0], padding[1], k_out=p["w"].shape[0])
    y = fused_matmul(patches, p["w"], p["scale"], p["bias"],
                     n_valid=p["n"], relu=True, out_dtype=jnp.bfloat16)
    return y.reshape(B, Ho, Wo, p["n"])


def _split_channels(x, splits):
    outs, off = [], 0
    for s in splits:
        outs.append(x[..., off:off + s])
        off += s
    return outs


def max_pool_3x3_s2(x):
    # F.max_pool2d(kernel_size=3, stride=2), no padding, floor mode.  NHWC.
    B, H, W, C = x.shape
    Ho = (H - 3) // 2 + 1
    Wo = (W - 3) // 2 + 1
    out = None
    for i in range(3):
        for j in range(3):
            v = x[:, i:i + 2 * (Ho - 1) + 1:2, j:j + 2 * (Wo - 1) + 1:2, :]
            out = v if out is None else jnp.maximum(out, v)
    return out


def avg_pool_3x3_s1_p1(x):
    # F.avg_pool2d(kernel=3, stride=1, padding=1), count_include_pad=True. NHWC.
    B, H, W, C = x.shape
    xp = jnp.pad(x, ((0, 0), (1, 1), (1, 1), (0, 0)))
    acc = jnp.zeros((B, H, W, C), jnp.float32)
    for i in range(3):
        for j in range(3):
            acc = acc + xp[:, i:i + H, j:j + W, :].astype(jnp.float32)
    return (acc / 9.0).astype(x.dtype)


def _linear_weights(in_size, out_size):
    # Interpolation matrix for bilinear resize with align_corners=True.
    if out_size == 1:
        src = np.zeros((1,), np.float64)
    else:
        src = np.arange(out_size, dtype=np.float64) * (in_size - 1) / (out_size - 1)
    i0 = np.clip(np.floor(src).astype(np.int64), 0, in_size - 1)
    i1 = np.clip(i0 + 1, 0, in_size - 1)
    frac = src - np.floor(src)
    w = np.zeros((out_size, in_size), np.float32)
    w[np.arange(out_size), i0] += (1.0 - frac).astype(np.float32)
    w[np.arange(out_size), i1] += frac.astype(np.float32)
    return jnp.asarray(w)


def bilinear_resize_align_corners(x_nchw, out_h, out_w):
    B, C, H, W = x_nchw.shape
    wy = _linear_weights(H, out_h)  # (out_h, H)
    wx = _linear_weights(W, out_w)  # (out_w, W)
    x = jnp.einsum("oh,bchw->bcow", wy, x_nchw)
    x = jnp.einsum("pw,bcow->bcop", wx, x)
    return x


# ---------------------------------------------------------------------------
# Deterministic synthetic Inception-v3 parameters (BN folded, pre-padded bf16)
# ---------------------------------------------------------------------------
class KeyGen:
    def __init__(self, seed=0):
        self._key = jax.random.PRNGKey(seed)
        self._i = 0

    def __call__(self):
        self._i += 1
        return jax.random.fold_in(self._key, self._i)


def _init_bconv(key, cin, cout, kh, kw):
    k1, k2, k3, k4, k5 = jax.random.split(key, 5)
    fan_in = cin * kh * kw
    w = jax.random.normal(k1, (cout, cin, kh, kw), jnp.float32) * float(np.sqrt(2.0 / fan_in))
    gamma = 1.0 + 0.1 * jax.random.normal(k2, (cout,), jnp.float32)
    beta = 0.1 * jax.random.normal(k3, (cout,), jnp.float32)
    rmean = 0.1 * jax.random.normal(k4, (cout,), jnp.float32)
    rvar = 1.0 + 0.1 * jnp.abs(jax.random.normal(k5, (cout,), jnp.float32))
    scale = gamma / jnp.sqrt(rvar + 1e-3)       # BatchNorm eps = 0.001 (eval mode)
    bias = beta - rmean * scale
    # (O, C, KH, KW) -> (KH*KW*C, O): rows ordered (kh, kw, c) to match im2col.
    wmat = jnp.transpose(w, (2, 3, 1, 0)).reshape(kh * kw * cin, cout)
    return {"w": wmat, "scale": scale, "bias": bias, "ksize": (kh, kw)}


def _merge_1x1(raws):
    # Concatenate several 1x1 convs (same input) along the output-channel axis.
    w = jnp.concatenate([r["w"] for r in raws], axis=1)
    scale = jnp.concatenate([r["scale"] for r in raws])
    bias = jnp.concatenate([r["bias"] for r in raws])
    splits = tuple(int(r["w"].shape[1]) for r in raws)
    return {"w": w, "scale": scale, "bias": bias, "ksize": (1, 1)}, splits


def _fold_avgpool_3x3(raw1x1):
    # AvgPool3x3(s1,p1,count_include_pad) + 1x1 conv == 3x3 conv with w/9.
    C, O = raw1x1["w"].shape
    w3 = jnp.tile(raw1x1["w"] / 9.0, (9, 1))        # (9*C, O)
    return {"w": w3, "scale": raw1x1["scale"], "bias": raw1x1["bias"],
            "ksize": (3, 3)}


def _pad_sb(raw, Np, N):
    scale = jnp.pad(raw["scale"].reshape(1, -1).astype(jnp.float32),
                    ((0, 0), (0, Np - N)))
    bias = jnp.pad(raw["bias"].reshape(1, -1).astype(jnp.float32),
                   ((0, 0), (0, Np - N)))
    return scale, bias


def _prep_gemm(raw, splits=None):
    """GEMM path (1x1 convs, stride-2 im2col convs, fc)."""
    K, N = raw["w"].shape
    kh, kw = raw["ksize"]
    Kp = K if (kh == 1 and kw == 1) else _round_up(K, 128)
    _, Np = _plan_n(N)
    w = jnp.pad(raw["w"], ((0, Kp - K), (0, Np - N))).astype(jnp.bfloat16)
    scale, bias = _pad_sb(raw, Np, N)
    out = {"mode": "gemm", "w": w, "scale": scale, "bias": bias,
           "ksize": (kh, kw), "n": N}
    if splits is not None:
        out["splits"] = splits
    return out


def _prep_tap(raw):
    """Tap path (stride-1 spatial convs): weights kept at exact K = kh*kw*cin."""
    K, N = raw["w"].shape
    kh, kw = raw["ksize"]
    Np = _round_up(N, 128)
    w = jnp.pad(raw["w"], ((0, 0), (0, Np - N))).astype(jnp.bfloat16)
    scale, bias = _pad_sb(raw, Np, N)
    return {"mode": "tap", "w": w, "scale": scale, "bias": bias,
            "ksize": (kh, kw), "n": N}


def _init_inception_a(kg, cin, pool_features):
    b1x1 = _init_bconv(kg(), cin, 64, 1, 1)
    b5x5_1 = _init_bconv(kg(), cin, 48, 1, 1)
    b5x5_2 = _init_bconv(kg(), 48, 64, 5, 5)
    b3x3dbl_1 = _init_bconv(kg(), cin, 64, 1, 1)
    b3x3dbl_2 = _init_bconv(kg(), 64, 96, 3, 3)
    b3x3dbl_3 = _init_bconv(kg(), 96, 96, 3, 3)
    bpool = _init_bconv(kg(), cin, pool_features, 1, 1)
    merged, splits = _merge_1x1([b1x1, b5x5_1, b3x3dbl_1])
    return {
        "stem1x1": _prep_gemm(merged, splits),
        "b5x5_2": _prep_tap(b5x5_2),
        "b3x3dbl_2": _prep_tap(b3x3dbl_2),
        "b3x3dbl_3": _prep_tap(b3x3dbl_3),
        "bpool": _prep_tap(_fold_avgpool_3x3(bpool)),   # avgpool folded (exact)
    }


def _init_inception_b(kg, cin):
    return {
        "b3x3": _prep_gemm(_init_bconv(kg(), cin, 384, 3, 3)),       # stride 2
        "b3x3dbl_1": _prep_gemm(_init_bconv(kg(), cin, 64, 1, 1)),
        "b3x3dbl_2": _prep_tap(_init_bconv(kg(), 64, 96, 3, 3)),
        "b3x3dbl_3": _prep_gemm(_init_bconv(kg(), 96, 96, 3, 3)),    # stride 2
    }


def _init_inception_c(kg, cin, c7):
    b1x1 = _init_bconv(kg(), cin, 192, 1, 1)
    b7x7_1 = _init_bconv(kg(), cin, c7, 1, 1)
    b7x7_2 = _init_bconv(kg(), c7, c7, 1, 7)
    b7x7_3 = _init_bconv(kg(), c7, 192, 7, 1)
    b7x7dbl_1 = _init_bconv(kg(), cin, c7, 1, 1)
    b7x7dbl_2 = _init_bconv(kg(), c7, c7, 7, 1)
    b7x7dbl_3 = _init_bconv(kg(), c7, c7, 1, 7)
    b7x7dbl_4 = _init_bconv(kg(), c7, c7, 7, 1)
    b7x7dbl_5 = _init_bconv(kg(), c7, 192, 1, 7)
    bpool = _init_bconv(kg(), cin, 192, 1, 1)
    merged, splits = _merge_1x1([b1x1, b7x7_1, b7x7dbl_1])
    return {
        "stem1x1": _prep_gemm(merged, splits),
        "b7x7_2": _prep_tap(b7x7_2),
        "b7x7_3": _prep_tap(b7x7_3),
        "b7x7dbl_2": _prep_tap(b7x7dbl_2),
        "b7x7dbl_3": _prep_tap(b7x7dbl_3),
        "b7x7dbl_4": _prep_tap(b7x7dbl_4),
        "b7x7dbl_5": _prep_tap(b7x7dbl_5),
        "bpool": _prep_gemm(bpool),
    }


def _init_inception_d(kg, cin):
    b3x3_1 = _init_bconv(kg(), cin, 192, 1, 1)
    b3x3_2 = _init_bconv(kg(), 192, 320, 3, 3)
    b7x7x3_1 = _init_bconv(kg(), cin, 192, 1, 1)
    b7x7x3_2 = _init_bconv(kg(), 192, 192, 1, 7)
    b7x7x3_3 = _init_bconv(kg(), 192, 192, 7, 1)
    b7x7x3_4 = _init_bconv(kg(), 192, 192, 3, 3)
    merged, splits = _merge_1x1([b3x3_1, b7x7x3_1])
    return {
        "stem1x1": _prep_gemm(merged, splits),
        "b3x3_2": _prep_gemm(b3x3_2),                                # stride 2
        "b7x7x3_2": _prep_tap(b7x7x3_2),
        "b7x7x3_3": _prep_tap(b7x7x3_3),
        "b7x7x3_4": _prep_gemm(b7x7x3_4),                            # stride 2
    }


def _init_inception_e(kg, cin):
    b1x1 = _init_bconv(kg(), cin, 320, 1, 1)
    b3x3_1 = _init_bconv(kg(), cin, 384, 1, 1)
    b3x3_2a = _init_bconv(kg(), 384, 384, 1, 3)
    b3x3_2b = _init_bconv(kg(), 384, 384, 3, 1)
    b3x3dbl_1 = _init_bconv(kg(), cin, 448, 1, 1)
    b3x3dbl_2 = _init_bconv(kg(), 448, 384, 3, 3)
    b3x3dbl_3a = _init_bconv(kg(), 384, 384, 1, 3)
    b3x3dbl_3b = _init_bconv(kg(), 384, 384, 3, 1)
    bpool = _init_bconv(kg(), cin, 192, 1, 1)
    merged, splits = _merge_1x1([b1x1, b3x3_1, b3x3dbl_1])
    return {
        "stem1x1": _prep_gemm(merged, splits),
        "b3x3_2a": _prep_tap(b3x3_2a),
        "b3x3_2b": _prep_tap(b3x3_2b),
        "b3x3dbl_2": _prep_tap(b3x3dbl_2),
        "b3x3dbl_3a": _prep_tap(b3x3dbl_3a),
        "b3x3dbl_3b": _prep_tap(b3x3dbl_3b),
        "bpool": _prep_gemm(bpool),
    }


def init_inception_v3_params(seed=0):
    kg = KeyGen(seed)
    p = {
        "Conv2d_1a_3x3": _prep_gemm(_init_bconv(kg(), 3, 32, 3, 3)),   # stride 2
        "Conv2d_2a_3x3": _prep_tap(_init_bconv(kg(), 32, 32, 3, 3)),
        "Conv2d_2b_3x3": _prep_tap(_init_bconv(kg(), 32, 64, 3, 3)),
        "Conv2d_3b_1x1": _prep_gemm(_init_bconv(kg(), 64, 80, 1, 1)),
        "Conv2d_4a_3x3": _prep_tap(_init_bconv(kg(), 80, 192, 3, 3)),
        "Mixed_5b": _init_inception_a(kg, 192, 32),
        "Mixed_5c": _init_inception_a(kg, 256, 64),
        "Mixed_5d": _init_inception_a(kg, 288, 64),
        "Mixed_6a": _init_inception_b(kg, 288),
        "Mixed_6b": _init_inception_c(kg, 768, 128),
        "Mixed_6c": _init_inception_c(kg, 768, 160),
        "Mixed_6d": _init_inception_c(kg, 768, 160),
        "Mixed_6e": _init_inception_c(kg, 768, 192),
        "Mixed_7a": _init_inception_d(kg, 768),
        "Mixed_7b": _init_inception_e(kg, 1280),
        "Mixed_7c": _init_inception_e(kg, 2048),
    }
    fc_w = jax.random.normal(kg(), (1000, 2048), jnp.float32) * float(1.0 / np.sqrt(2048.0))
    fc_b = 0.01 * jax.random.normal(kg(), (1000,), jnp.float32)
    fc_raw = {"w": jnp.transpose(fc_w), "scale": jnp.ones((1000,), jnp.float32),
              "bias": fc_b, "ksize": (1, 1)}
    p["fc"] = _prep_gemm(fc_raw)
    return p


# ---------------------------------------------------------------------------
# Inception blocks (torchvision topology, NHWC, concat on channel axis)
# ---------------------------------------------------------------------------
def _inception_a(x, p):
    b1, b5, b3 = _split_channels(conv_bn_relu(x, p["stem1x1"]),
                                 p["stem1x1"]["splits"])
    b5 = conv_bn_relu(b5, p["b5x5_2"], padding=(2, 2))
    b3 = conv_bn_relu(b3, p["b3x3dbl_2"], padding=(1, 1))
    b3 = conv_bn_relu(b3, p["b3x3dbl_3"], padding=(1, 1))
    bp = conv_bn_relu(x, p["bpool"], padding=(1, 1))   # avgpool folded into 3x3
    return jnp.concatenate([b1, b5, b3, bp], axis=-1)


def _inception_b(x, p):
    b3 = conv_bn_relu(x, p["b3x3"], stride=(2, 2))
    bd = conv_bn_relu(x, p["b3x3dbl_1"])
    bd = conv_bn_relu(bd, p["b3x3dbl_2"], padding=(1, 1))
    bd = conv_bn_relu(bd, p["b3x3dbl_3"], stride=(2, 2))
    bp = max_pool_3x3_s2(x)
    return jnp.concatenate([b3, bd, bp], axis=-1)


def _inception_c(x, p):
    b1, b7, bd = _split_channels(conv_bn_relu(x, p["stem1x1"]),
                                 p["stem1x1"]["splits"])
    b7 = conv_bn_relu(b7, p["b7x7_2"], padding=(0, 3))
    b7 = conv_bn_relu(b7, p["b7x7_3"], padding=(3, 0))
    bd = conv_bn_relu(bd, p["b7x7dbl_2"], padding=(3, 0))
    bd = conv_bn_relu(bd, p["b7x7dbl_3"], padding=(0, 3))
    bd = conv_bn_relu(bd, p["b7x7dbl_4"], padding=(3, 0))
    bd = conv_bn_relu(bd, p["b7x7dbl_5"], padding=(0, 3))
    bp = conv_bn_relu(avg_pool_3x3_s1_p1(x), p["bpool"])
    return jnp.concatenate([b1, b7, bd, bp], axis=-1)


def _inception_d(x, p):
    b3, b7 = _split_channels(conv_bn_relu(x, p["stem1x1"]),
                             p["stem1x1"]["splits"])
    b3 = conv_bn_relu(b3, p["b3x3_2"], stride=(2, 2))
    b7 = conv_bn_relu(b7, p["b7x7x3_2"], padding=(0, 3))
    b7 = conv_bn_relu(b7, p["b7x7x3_3"], padding=(3, 0))
    b7 = conv_bn_relu(b7, p["b7x7x3_4"], stride=(2, 2))
    bp = max_pool_3x3_s2(x)
    return jnp.concatenate([b3, b7, bp], axis=-1)


def _inception_e(x, p):
    b1, b3, bd = _split_channels(conv_bn_relu(x, p["stem1x1"]),
                                 p["stem1x1"]["splits"])
    b3 = jnp.concatenate([
        conv_bn_relu(b3, p["b3x3_2a"], padding=(0, 1)),
        conv_bn_relu(b3, p["b3x3_2b"], padding=(1, 0)),
    ], axis=-1)
    bd = conv_bn_relu(bd, p["b3x3dbl_2"], padding=(1, 1))
    bd = jnp.concatenate([
        conv_bn_relu(bd, p["b3x3dbl_3a"], padding=(0, 1)),
        conv_bn_relu(bd, p["b3x3dbl_3b"], padding=(1, 0)),
    ], axis=-1)
    bp = conv_bn_relu(avg_pool_3x3_s1_p1(x), p["bpool"])
    return jnp.concatenate([b1, b3, bd, bp], axis=-1)


# ---------------------------------------------------------------------------
# WrapInception.forward
# ---------------------------------------------------------------------------
_IMAGENET_MEAN = jnp.asarray([0.485, 0.456, 0.406], jnp.float32).reshape(1, 3, 1, 1)
_IMAGENET_STD = jnp.asarray([0.229, 0.224, 0.225], jnp.float32).reshape(1, 3, 1, 1)


def wrap_inception_forward(params, x_nchw):
    x = (x_nchw.astype(jnp.float32) + 1.0) / 2.0
    x = (x - _IMAGENET_MEAN) / _IMAGENET_STD
    if x.shape[2] != 299 or x.shape[3] != 299:
        x = bilinear_resize_align_corners(x, 299, 299)
    x = jnp.transpose(x, (0, 2, 3, 1)).astype(jnp.bfloat16)   # NCHW -> NHWC, bf16
    x = conv_bn_relu(x, params["Conv2d_1a_3x3"], stride=(2, 2))
    x = conv_bn_relu(x, params["Conv2d_2a_3x3"])
    x = conv_bn_relu(x, params["Conv2d_2b_3x3"], padding=(1, 1))
    x = max_pool_3x3_s2(x)
    x = conv_bn_relu(x, params["Conv2d_3b_1x1"])
    x = conv_bn_relu(x, params["Conv2d_4a_3x3"])
    x = max_pool_3x3_s2(x)
    x = _inception_a(x, params["Mixed_5b"])
    x = _inception_a(x, params["Mixed_5c"])
    x = _inception_a(x, params["Mixed_5d"])
    x = _inception_b(x, params["Mixed_6a"])
    x = _inception_c(x, params["Mixed_6b"])
    x = _inception_c(x, params["Mixed_6c"])
    x = _inception_c(x, params["Mixed_6d"])
    x = _inception_c(x, params["Mixed_6e"])
    x = _inception_d(x, params["Mixed_7a"])
    x = _inception_e(x, params["Mixed_7b"])
    x = _inception_e(x, params["Mixed_7c"])
    pool = global_avg_pool(x)                              # (B, 2048) f32, Pallas
    # F.dropout(training=False) is the identity; fc via the Pallas GEMM kernel
    # (tm=8 batch-sized tile, identity "scale", bias as BN-bias).
    fc = params["fc"]
    logits = fused_matmul(pool, fc["w"], fc["scale"], fc["bias"],
                          n_valid=fc["n"], relu=False, out_dtype=jnp.float32)
    return pool, logits


if __name__ == "__main__":
    params = init_inception_v3_params(seed=0)
    key = jax.random.PRNGKey(0)
    # Small NCHW input in [-1, 1]; the forward resizes it to 299x299 itself.
    x = jax.random.uniform(key, (2, 3, 16, 16), jnp.float32, minval=-1.0, maxval=1.0)
    pool, logits = wrap_inception_forward(params, x)
    pool, logits = jax.block_until_ready((pool, logits))
    assert pool.shape == (2, 2048), pool.shape
    assert logits.shape == (2, 1000), logits.shape
    assert bool(jnp.all(jnp.isfinite(pool))) and bool(jnp.all(jnp.isfinite(logits)))
    print("KERNEL_OK")
</pallas_src>

<mosaic_0001>
module attributes {stable_mosaic.version = 11 : i64} {
  func.func @_matmul_bn_act_kernel(%arg0: i32, %arg1: i32, %arg2: i32, %arg3: memref<1024x128xbf16, #tpu.memory_space<vmem>>, %arg4: memref<128x128xbf16, #tpu.memory_space<vmem>>, %arg5: memref<1x128xf32, #tpu.memory_space<vmem>>, %arg6: memref<1x128xf32, #tpu.memory_space<vmem>>, %arg7: memref<1024x128xbf16, #tpu.memory_space<vmem>>, %arg8: memref<1024x128xf32, #tpu.memory_space<vmem>>) attributes {dimension_semantics = [#tpu.dimension_semantics<parallel>, #tpu.dimension_semantics<parallel>, #tpu.dimension_semantics<arbitrary>], iteration_bounds = array<i64: 44, 1, 1>, scalar_prefetch = 0 : i64, scratch_operands = 1 : i64, tpu.core_type = #tpu.core_type<tc>, window_params = [{transform_indices = @transform_0, window_bounds = array<i64: 1024, 128>}, {transform_indices = @transform_1, window_bounds = array<i64: 128, 128>}, {transform_indices = @transform_2, window_bounds = array<i64: 1, 128>}, {transform_indices = @transform_3, window_bounds = array<i64: 1, 128>}, {transform_indices = @transform_4, window_bounds = array<i64: 1024, 128>}]} {
    %c0_i32 = arith.constant 0 : i32
    %0 = arith.cmpi eq, %arg2, %c0_i32 : i32
    %1 = arith.extui %0 : i1 to i32
    %c0_i32_0 = arith.constant 0 : i32
    %2 = arith.cmpi ne, %1, %c0_i32_0 : i32
    scf.if %2 {
      %cst_10 = arith.constant 0.000000e+00 : f32
      %12 = vector.broadcast %cst_10 : f32 to vector<1024x128xf32>
      %c0_11 = arith.constant 0 : index
      %c0_12 = arith.constant 0 : index
      %13 = vector.load %arg8[%c0_11, %c0_12] : memref<1024x128xf32, #tpu.memory_space<vmem>>, vector<1024x128xf32>
      tpu.vector_store %arg8[%c0_11, %c0_12], %12 {strides = array<i32>} : memref<1024x128xf32, #tpu.memory_space<vmem>>, vector<1024x128xf32>,
    } else {
    }
    %c0 = arith.constant 0 : index
    %c0_1 = arith.constant 0 : index
    %3 = vector.load %arg8[%c0, %c0_1] : memref<1024x128xf32, #tpu.memory_space<vmem>>, vector<1024x128xf32>
    %c0_2 = arith.constant 0 : index
    %c0_3 = arith.constant 0 : index
    %4 = vector.load %arg3[%c0_2, %c0_3] : memref<1024x128xbf16, #tpu.memory_space<vmem>>, vector<1024x128xbf16>
    %c0_4 = arith.constant 0 : index
    %c0_5 = arith.constant 0 : index
    %5 = vector.load %arg4[%c0_4, %c0_5] : memref<128x128xbf16, #tpu.memory_space<vmem>>, vector<128x128xbf16>
    %cst = arith.constant dense<0.000000e+00> : vector<1024x128xf32>
    %6 = tpu.matmul %4, %5, %cst {dimension_numbers = #tpu.dot_dimension_numbers<[1], [0], [0], [1], [0, 0, 1, 1], [], []>} : vector<1024x128xbf16>, vector<128x128xbf16>, vector<1024x128xf32> -> vector<1024x128xf32>
    %7 = arith.addf %3, %6 : vector<1024x128xf32>
    %c0_6 = arith.constant 0 : index
    %c0_7 = arith.constant 0 : index
    %8 = vector.load %arg8[%c0_6, %c0_7] : memref<1024x128xf32, #tpu.memory_space<vmem>>, vector<1024x128xf32>
    tpu.vector_store %arg8[%c0_6, %c0_7], %7 {strides = array<i32>} : memref<1024x128xf32, #tpu.memory_space<vmem>>, vector<1024x128xf32>,
    %c0_i32_8 = arith.constant 0 : i32
    %9 = arith.cmpi eq, %arg2, %c0_i32_8 : i32
    %10 = arith.extui %9 : i1 to i32
    %c0_i32_9 = arith.constant 0 : i32
    %11 = arith.cmpi ne, %10, %c0_i32_9 : i32
    scf.if %11 {
      %c0_10 = arith.constant 0 : index
      %c0_11 = arith.constant 0 : index
      %12 = vector.load %arg8[%c0_10, %c0_11] : memref<1024x128xf32, #tpu.memory_space<vmem>>, vector<1024x128xf32>
      %c0_12 = arith.constant 0 : index
      %c0_13 = arith.constant 0 : index
      %13 = vector.load %arg5[%c0_12, %c0_13] : memref<1x128xf32, #tpu.memory_space<vmem>>, vector<1x128xf32>
      %14 = vector.broadcast %13 : vector<1x128xf32> to vector<1024x128xf32>
      %15 = arith.mulf %12, %14 : vector<1024x128xf32>
      %c0_14 = arith.constant 0 : index
      %c0_15 = arith.constant 0 : index
      %16 = vector.load %arg6[%c0_14, %c0_15] : memref<1x128xf32, #tpu.memory_space<vmem>>, vector<1x128xf32>
      %17 = vector.broadcast %16 : vector<1x128xf32> to vector<1024x128xf32>
      %18 = arith.addf %15, %17 : vector<1024x128xf32>
      %cst_16 = arith.constant 0.000000e+00 : f32
      %19 = vector.broadcast %cst_16 : f32 to vector<1024x128xf32>
      %20 = arith.maximumf %18, %19 : vector<1024x128xf32>
      %21 = arith.truncf %20 : vector<1024x128xf32> to vector<1024x128xbf16>
      %c0_17 = arith.constant 0 : index
      %c0_18 = arith.constant 0 : index
      %22 = vector.load %arg7[%c0_17, %c0_18] : memref<1024x128xbf16, #tpu.memory_space<vmem>>, vector<1024x128xbf16>
      tpu.vector_store %arg7[%c0_17, %c0_18], %21 {strides = array<i32>} : memref<1024x128xbf16, #tpu.memory_space<vmem>>, vector<1024x128xbf16>,
    } else {
    }
    return
  }
  func.func @transform_0(%arg0: i32, %arg1: i32, %arg2: i32) -> (i32, i32) {
    %c0_i32 = arith.constant 0 : i32
    return %arg0, %arg2 : i32, i32
  }
  func.func @transform_1(%arg0: i32, %arg1: i32, %arg2: i32) -> (i32, i32) {
    %c0_i32 = arith.constant 0 : i32
    return %arg2, %arg1 : i32, i32
  }
  func.func @transform_2(%arg0: i32, %arg1: i32, %arg2: i32) -> (i32, i32) {
    %c0_i32 = arith.constant 0 : i32
    %c0_i32_0 = arith.constant 0 : i32
    return %c0_i32, %arg1 : i32, i32
  }
  func.func @transform_3(%arg0: i32, %arg1: i32, %arg2: i32) -> (i32, i32) {
    %c0_i32 = arith.constant 0 : i32
    %c0_i32_0 = arith.constant 0 : i32
    return %c0_i32, %arg1 : i32, i32
  }
  func.func @transform_4(%arg0: i32, %arg1: i32, %arg2: i32) -> (i32, i32) {
    %c0_i32 = arith.constant 0 : i32
    return %arg0, %arg1 : i32, i32
  }
}

</mosaic_0001>

<bundles_post_ra>
// kernel: fused_matmul.1
= control target key start
LH: loop header
LB: loop body
LE: loop exit
PB: predicated region body
PF: predicated region fallthrough
CT: control target
= control target key end

     0   :  { %9 = vsyncpa [#allocation4], 0  ;;  %s5956_s0 = inlined_call_operand.hbm [shape: bf16[44402,128], index: 0, kind: input, shape index: {}]   ;;  %s5957_s1 = inlined_call_operand.hbm [shape: bf16[128,128], index: 1, kind: input, shape index: {}]   ;;  %s5958_s2 = inlined_call_operand.hbm [shape: f32[1,128], index: 2, kind: input, shape index: {}]   ;;  %s5959_s3 = inlined_call_operand.hbm [shape: f32[1,128], index: 3, kind: input, shape index: {}]   ;;  %s5960_s4 = inlined_call_operand.vmem [shape: bf16[44402,32], index: 4, kind: output, shape index: {}]  }
   0x1   :  { %11 = vsyncpa [#allocation4 + $0x1], 0 }
   0x2   :  { %12 = vsyncpa [#allocation6], 0 }
   0x3   :  { %13 = vsyncpa [#allocation9], 0  ;;  %s5132_s15 = smov 0   ;;  %s5134_s16 = smov 0  }
   0x4   :  { %s5136_s17 = smov 0   ;;  %s5138_s18 = smov 0  }
   0x5   :  { %s5140_s19 = smov 0   ;;  %s5142_s20 = smov 0  }
   0x6 LB: > { %s3655_s21 = sadd.s32 4294967295, %s5065_s20   ;;  %s38_s22 = sadd.s32 1, %s5061_s19  ;;  %s5065_s20 = sphi %s5142_s20, %s19_s20   ;;  %s5061_s19 = sphi %s5140_s19, %s5986_s19   ;;  %s5057_s18 = sphi %s5138_s18, %s5985_s18   ;;  %s5053_s17 = sphi %s5136_s17, %s5984_s17   ;;  %s5049_s16 = sphi %s5134_s16, %s5983_s16   ;;  %s5045_s15 = sphi %s5132_s15, %s5982_s15  }
   0x7   : > { %p40_p0 = scmp.ge.s32.totalorder %s38_s22, 44  ;;  %s47_s23 = sadd.s32 1, %s5053_s17 }
   0x8   : > { %p54_p1 = scmp.ne.s32.totalorder %s5053_s17, %s5049_s16  ;;  %p55_p2 = scmp.eq.s32.totalorder %s5065_s20, 0 }
   0x9   : > { %s5988_s22 = smov (%p40_p0, %s38_s22), 0  ;;  %p60_p4 = scmp.ne.s32.totalorder %s5049_s16, %s5045_s15 }
   0xa   : > { %5965 = sst [smem:[#allocation14_spill]] %s5988_s22  ;;  %p5168_p3 = por %p55_p2, %p54_p1 }
   0xb   : > { %s42_s25 = ssub.s32 %s5061_s19, %s5988_s22  ;;  %p5175_p5 = scmp.eq.s32.totalorder %s3655_s21, 0 }
   0xc   : > { %p45_p6 = scmp.eq.s32.totalorder %s42_s25, 0  ;;  %p166_p7 = scmp.eq.s32.totalorder %s3655_s21, 43 }
   0xd   : > { %s5967_s26 = scalar_select %p5175_p5, 1, 0 }
   0xe   : > { %p5181_p8 = por %p5175_p5, %p60_p4  ;;  %p3657_p9 = scmp.ge.s32.totalorder %s5065_s20, 1 }
   0xf   : > { %s5187_s28 = scalar_select %p45_p6, %s5053_s17, %s47_s23  }
  0x10   : > { %s5968_s27 = scalar_select %p5181_p8, 1, 0 }
  0x11   : > { %5969 = sst [smem:[#allocation15_spill]] %s5187_s28  ;;  %p5189_p10 = por %p166_p7, %p54_p1 }
  0x12   : > { %p179_p11 = scmp.lt.s32.totalorder %s5065_s20, 45  ;;  %s5099_s5 = smov [#allocation5]  }
  0x13   : > { %s5970_s29 = scalar_select %p5189_p10, 1, 0 }
  0x14   : > { %p5194_p12 = pnand %p3657_p9, %p179_p11  ;;  %s195_s6 = sshll.u32 %s5099_s5, 4  ;;  %s5198_s6 = int_to_ptr.vmem [resolvable:$true] %s195_s6 }
  0x15   : > { %s5100_s8 = smov [#allocation7]   ;;  %s5101_s10 = smov [#allocation8]  }
  0x16   : > { %p4654_p13 = pneg %p5194_p12  ;;  %s211_s9 = sshll.u32 %s5100_s8, 4  ;;  %s5208_s9 = int_to_ptr.vmem [resolvable:$true] %s211_s9 }
  0x17   : > { %s224_s11 = sshll.u32 %s5101_s10, 4  ;;  %s4863_s14 = scalar_lea.hbm %s5957_s1, 1024  ;;  %s5210_s11 = int_to_ptr.vmem [resolvable:$true] %s224_s11 }
  0x18   : > { %p5204_p0 = pnand %p4654_p13, %p5175_p5  ;;  %p4864_p1 = scmp.ne.s32.totalorder %s5957_s1, %s4863_s14 }
  0x19   : > { %p4870_p7 = scmp.lt.u32.totalorder %s4863_s14, %s5957_s1 }
  0x1a   : > { %p5220_p2 = pneg %p5204_p0 }
  0x1c   : > { %p4866_p4 = pnand %p5220_p2, %p4864_p1 }
  0x1e   : > { %p4867_p6 = pneg %p4866_p4 }
  0x20   : > { %p4872_p9 = pnand %p4870_p7, %p4867_p6 }
  0x22   : > { %4875 = shalt.err (!%p4872_p9)
}
  0x23   : > { %s4876_s8 = scalar_lea.vmem %s5198_s6, 1024  ;;  %p4884_p5 = scmp.lt.s32.totalorder %s5198_s6, %s5198_s6 }
  0x24   : > { %p4877_p11 = scmp.ne.s32.totalorder %s5198_s6, %s4876_s8  ;;  %p4885_p8 = scmp.lt.s32.totalorder %s4876_s8, %s4876_s8 }
  0x26   : > { %p4879_p13 = pnand %p4877_p11, %p5220_p2  ;;  %p4886_p1 = por %p4885_p8, %p4884_p5 }
  0x28   : > { %p4880_p10 = pneg %p4879_p13 }
  0x2a   : > { %p4887_p4 = pnand %p4886_p1, %p4880_p10 }
  0x2c   : > { %4890 = shalt.err (!%p4887_p4)
}
  0x2d   : > { %s5102_s10 = smov 64   ;;  %s5103_s12 = smov 4  }
  0x2e   : > { %4657 = dma.hbm_to_vmem [thread:$0]  (!%p5204_p0), %s5957_s1, 1024, %s5198_s6, [#allocation6], %s5102_s10, %s5102_s10, %s5103_s12  }
  0x2f   : > { %s4891_s25 = scalar_lea.hbm %s5958_s2, 16 }
  0x30   : > { %p4892_p5 = scmp.ne.s32.totalorder %s5958_s2, %s4891_s25  ;;  %p4898_p6 = scmp.lt.u32.totalorder %s4891_s25, %s5958_s2 }
  0x32   : > { %p4894_p8 = pnand %p4892_p5, %p5220_p2 }
  0x34   : > { %p4895_p10 = pneg %p4894_p8 }
  0x36   : > { %p4900_p7 = pnand %p4898_p6, %p4895_p10 }
  0x38   : > { %4903 = shalt.err (!%p4900_p7)
}
  0x39   : > { %s4904_s6 = scalar_lea.vmem %s5208_s9, 16  ;;  %s4911_s22 = scalar_lea.vmem %s5208_s9, 32 }
  0x3a   : > { %p4905_p9 = scmp.ne.s32.totalorder %s5208_s9, %s4904_s6  ;;  %p4912_p1 = scmp.lt.s32.totalorder %s5208_s9, %s5208_s9 }
  0x3b   : > { %p4913_p4 = scmp.lt.s32.totalorder %s4911_s22, %s4904_s6 }
  0x3c   : > { %p4907_p11 = pnand %p4905_p9, %p5220_p2 }
  0x3d   : > { %p4914_p5 = por %p4913_p4, %p4912_p1 }
  0x3e   : > { %p4908_p13 = pneg %p4907_p11 }
  0x40   : > { %p4915_p8 = pnand %p4914_p5, %p4908_p13 }
  0x42   : > { %4918 = shalt.err (!%p4915_p8)
}
  0x43   : > { %4660 = dma.hbm_to_vmem [thread:$0]  (!%p5204_p0), %s5958_s2, 16, %s5208_s9, [#allocation6]  }
  0x44   : > { %s4919_s14 = scalar_lea.hbm %s5959_s3, 16 }
  0x45   : > { %p4920_p10 = scmp.ne.s32.totalorder %s5959_s3, %s4919_s14  ;;  %p4926_p9 = scmp.lt.u32.totalorder %s4919_s14, %s5959_s3 }
  0x47   : > { %p4922_p6 = pnand %p4920_p10, %p5220_p2 }
  0x49   : > { %p4923_p7 = pneg %p4922_p6 }
  0x4b   : > { %p4928_p11 = pnand %p4926_p9, %p4923_p7 }
  0x4d   : > { %4931 = shalt.err (!%p4928_p11)
}
  0x4e   : > { %s4932_s9 = scalar_lea.vmem %s5210_s11, 16  ;;  %s4939_s8 = scalar_lea.vmem %s5210_s11, 32 }
  0x4f   : > { %p4933_p13 = scmp.ne.s32.totalorder %s5210_s11, %s4932_s9  ;;  %p4940_p5 = scmp.lt.s32.totalorder %s5210_s11, %s5210_s11 }
  0x50   : > { %p4941_p8 = scmp.lt.s32.totalorder %s4939_s8, %s4932_s9 }
  0x51   : > { %p4935_p1 = pnand %p4933_p13, %p5220_p2 }
  0x52   : > { %p4942_p10 = por %p4941_p8, %p4940_p5 }
  0x53   : > { %p4936_p4 = pneg %p4935_p1 }
  0x55   : > { %p4943_p6 = pnand %p4942_p10, %p4936_p4 }
  0x57   : > { %4946 = shalt.err (!%p4943_p6)
}
  0x58   : > { %4663 = dma.hbm_to_vmem [thread:$0]  (!%p5204_p0), %s5959_s3, 16, %s5210_s11, [#allocation9]  }
  0x59   : > { %p3661_p7 = scmp.ge.s32.totalorder %s5065_s20, 44 }
  0x5b   : > { %231 = sbr.rel (%p3661_p7) target bundleno = 133 (0x85), region = 28 }
  0x62   : > { %234 = sbr.rel (!%p5168_p3) target bundleno = 133 (0x85), region = 32  ;;  %s235_s23 = sand.u32 (%p5168_p3), 1, %s5053_s17  }
  0x63   : > { %s3663_s28 = sshll.u32 (%p5168_p3), %s5061_s19, 7  ;;  %s3662_s10 = sshll.u32 (%p5168_p3), %s235_s23, 9 }
  0x64   : > { %s241_s12 = ssub.s32 (%p5168_p3), 5551, %s3663_s28  ;;  %s5297_s14 = scalar_lea.sflag (%p5168_p3), [#allocation4], %s235_s23 }
  0x65   : > { %p242_p2 = scmp.lt.s32.totalorder (%p5168_p3), %s241_s12, 128  ;;  %s239_s11 = scalar_lea.vmem (%p5168_p3), [#allocation3], %s3662_s10 }
  0x69   : > { %s5990_s12 = smov (!%p242_p2, %s241_s12), 128 }
  0x6a   : > { %s5294_s7 = sshll.u32 %s5990_s12, 6 }
  0x6b   : > { %s246_s13 = ssub.s32 8192, %s5294_s7 }
  0x6c   : > { %247 = vsyncadd %s5297_s14, %s246_s13  ;;  %p3665_p3 = scmp.ne.s32.totalorder %s5294_s7, 0  ;;  %s3894_s24 = sshll.u32 %s5061_s19, 13 }
  0x6d   : > { %s5305_s25 = scalar_lea.hbm %s5956_s0, %s3894_s24  ;;  %s253_s5 = sshll.u32 %s239_s11, 4  ;;  %s5307_s5 = int_to_ptr.vmem [resolvable:$true] %s253_s5 }
  0x6e   : > { %s4947_s9 = scalar_lea.hbm %s5305_s25, %s5294_s7  ;;  %s4951_s22 = scalar_lea.hbm %s5956_s0, 355264 }
  0x6f   : > { %p4948_p0 = scmp.ne.s32.totalorder %s5305_s25, %s4947_s9  ;;  %p4952_p13 = scmp.lt.u32.totalorder %s5305_s25, %s5956_s0 }
  0x70   : > { %p4953_p1 = scmp.lt.u32.totalorder %s4951_s22, %s4947_s9  ;;  %p4955_p5 = scmp.lt.u32.totalorder %s4947_s9, %s5305_s25 }
  0x71   : > { %p4949_p9 = pnand %p4948_p0, %p3665_p3 }
  0x72   : > { %p4954_p4 = por %p4953_p1, %p4952_p13 }
  0x73   : > { %p4950_p11 = pneg %p4949_p9 }
  0x74   : > { %p4956_p8 = por %p4955_p5, %p4954_p4 }
  0x76   : > { %p4957_p10 = pnand %p4956_p8, %p4950_p11 }
  0x78   : > { %4960 = shalt.err (!%p4957_p10)
}
  0x79   : > { %s4961_s10 = scalar_lea.vmem %s5307_s5, %s5294_s7  ;;  %s5104_s12 = smov [#allocation3]  }
  0x7a   : > { %p4962_p6 = scmp.ne.s32.totalorder %s5307_s5, %s4961_s10  ;;  %s4965_s13 = sshll.u32 %s5104_s12, 4  ;;  %s4966_s13 = int_to_ptr.vmem [resolvable:$false] %s4965_s13 }
  0x7b   : > { %s4967_s11 = scalar_lea.vmem %s4966_s13, 16384  ;;  %p4968_p0 = scmp.lt.s32.totalorder %s5307_s5, %s4966_s13 }
  0x7c   : > { %p4963_p7 = pnand %p4962_p6, %p3665_p3  ;;  %p4969_p9 = scmp.lt.s32.totalorder %s4967_s11, %s4961_s10 }
  0x7e   : > { %p4964_p2 = pneg %p4963_p7  ;;  %p4970_p13 = por %p4969_p9, %p4968_p0 }
  0x80   : > { %p4971_p1 = pnand %p4970_p13, %p4964_p2 }
  0x82   : > { %4974 = shalt.err (!%p4971_p1)
}
  0x83   : > { %s5105_s24 = smov 64   ;;  %s5106_s15 = smov 4  }
  0x84   : > { %259 = dma.hbm_to_vmem [thread:$0]  (%p3665_p3), %s5305_s25, %s5294_s7, %s5307_s5, %s5297_s14, %s5105_s24, %s5105_s24, %s5106_s15  }
  0x85 PF: > { %265 = sbr.rel (%p5194_p12) target bundleno = 615 (0x267), region = 36  ;;  %s267_s21 = sand.u32 (!%p5194_p12), 1, %s5049_s16  }
  0x86   : > { %s5337_s9 = sshll.u32 (!%p5194_p12), %s267_s21, 9  ;;  %s268_s8 = scalar_lea.sflag (!%p5194_p12), [#allocation4], %s267_s21 }
  0x87   : > { %s5340_s6 = scalar_lea.vmem (!%p5194_p12), [#allocation3], %s5337_s9  ;;  %p5974_p11 = scmp.ne.s32.totalorder (!%p5194_p12), %s5968_s27, 0 }
  0x8c   : > { %5032 = dma.done.wait (%p5974_p11), %s268_s8, 8192  }
  0x8d   : > { %5034 = vsyncadd (%p5974_p11), %s268_s8, 4294959104  ;;  %p5975_p3 = scmp.ne.s32.totalorder %s5967_s26, 0 }
  0x8f   : > { %5036 = dma.done.wait (%p5975_p3), [#allocation6], 1040  }
  0x90   : > { %5038 = vsyncadd (%p5975_p3), [#allocation6], 4294966256 }
  0x91   : > { %5040 = dma.done.wait (%p5975_p3), [#allocation9], 16  }
  0x92   : > { %5042 = vsyncadd (%p5975_p3), [#allocation9], 4294967280  ;;  %v4789_v0 = vld [vmem:[#allocation5] sm:$0xff]   ;;  %v4790_v1 = vld [vmem:[#allocation5 + $0x8] sm:$0xff]   ;;  %s5443_s26 = scalar_lea.vmem [#allocation10], %s5337_s9   ;;  %p5976_p12 = scmp.ne.s32.totalorder %s5970_s29, 0 }
  0x93   : > { %4481 = vmatprep.subr.bf16.mxu0 %v4789_v0  ;;  %4625 = vmatprep.subr.bf16.mxu1 %v4789_v0  ;;  %v4791_v2 = vld [vmem:[#allocation5 + $0x10] sm:$0xff]   ;;  %v4792_v3 = vld [vmem:[#allocation5 + $0x18] sm:$0xff]   ;;  %v4797_v4 = vld [vmem:[%s5340_s6] sm:$0xff]   ;;  %s3878_s27 = sshll.u32 (%p5976_p12), %s5057_s18, 7  ;;  %s4023_s30 = sshll.u32 (%p5976_p12), %s5057_s18, 9 }
  0x94   : > { %4482 = vmatpush3.bf16.msra.mxu0 %v4789_v0  ;;  %4633 = vmatpush3.bf16.msra.mxu1 %v4789_v0  ;;  %v4798_v5 = vld [vmem:[%s5340_s6 + $0x100] sm:$0xff]   ;;  %v4794_v7 = vld [vmem:[#allocation5 + $0x28] sm:$0xff]   ;;  %v4795_v8 = vld [vmem:[#allocation5 + $0x30] sm:$0xff]   ;;  %s3133_s7 = ssub.s32 (%p5976_p12), 5551, %s3878_s27  ;;  %s5756_s5 = scalar_lea.vmem (%p5976_p12), %s5960_s4, %s4023_s30  }
  0x95   : > { %4483 = vmatprep.subr.bf16.mxu0 %v4790_v1  ;;  %4626 = vmatprep.subr.bf16.mxu1 %v4790_v1  ;;  %v4793_v6 = vld [vmem:[#allocation5 + $0x20] sm:$0xff]   ;;  %v4796_v9 = vld [vmem:[#allocation5 + $0x38] sm:$0xff]   ;;  %v4799_v10 = vld [vmem:[%s5340_s6 + $0x8] sm:$0xff]   ;;  %p3134_p4 = scmp.lt.s32.totalorder (%p5976_p12), %s3133_s7, 128 }
  0x96   : > { %4497 = vmatprep.mubr.bf16.mxu0 %v4797_v4  ;;  %4561 = vmatprep.mubr.bf16.mxu1 %v4798_v5  ;;  %v4800_v11 = vld [vmem:[%s5340_s6 + $0x108] sm:$0xff]   ;;  %v4801_v12 = vld [vmem:[%s5340_s6 + $0x10] sm:$0xff]   ;;  %v4803_v14 = vld [vmem:[%s5340_s6 + $0x18] sm:$0xff]  }
  0x97   : > { %v4802_v13 = vld [vmem:[%s5340_s6 + $0x110] sm:$0xff]   ;;  %v4804_v15 = vld [vmem:[%s5340_s6 + $0x118] sm:$0xff]   ;;  %v4805_v16 = vld [vmem:[%s5340_s6 + $0x20] sm:$0xff]  }
  0x98   : > { %4484 = vmatpush3.bf16.msra.mxu0 %v4790_v1  ;;  %4634 = vmatpush3.bf16.msra.mxu1 %v4790_v1  ;;  %v4806_v17 = vld [vmem:[%s5340_s6 + $0x120] sm:$0xff]   ;;  %v4807_v18 = vld [vmem:[%s5340_s6 + $0x28] sm:$0xff]   ;;  %v4809_v20 = vld [vmem:[%s5340_s6 + $0x30] sm:$0xff]  }
  0x99   : > { %4485 = vmatprep.subr.bf16.mxu0 %v4791_v2  ;;  %4627 = vmatprep.subr.bf16.mxu1 %v4791_v2  ;;  %v4808_v19 = vld [vmem:[%s5340_s6 + $0x128] sm:$0xff]   ;;  %v4810_v21 = vld [vmem:[%s5340_s6 + $0x130] sm:$0xff]   ;;  %v4811_v22 = vld [vmem:[%s5340_s6 + $0x38] sm:$0xff]  }
  0x9a   : > { %v4812_v23 = vld [vmem:[%s5340_s6 + $0x138] sm:$0xff]   ;;  %v4813_v24 = vld [vmem:[%s5340_s6 + $0x40] sm:$0xff]   ;;  %v4815_v26 = vld [vmem:[%s5340_s6 + $0x48] sm:$0xff]  }
  0x9b   : > { %v4814_v25 = vld [vmem:[%s5340_s6 + $0x140] sm:$0xff]   ;;  %v4816_v27 = vld [vmem:[%s5340_s6 + $0x148] sm:$0xff]   ;;  %v4817_v28 = vld [vmem:[%s5340_s6 + $0x50] sm:$0xff]  }
  0x9c   : > { %4486 = vmatpush3.bf16.msra.mxu0 %v4791_v2  ;;  %4635 = vmatpush3.bf16.msra.mxu1 %v4791_v2  ;;  %v4818_v29 = vld [vmem:[%s5340_s6 + $0x150] sm:$0xff]   ;;  %v4819_v30 = vld [vmem:[%s5340_s6 + $0x58] sm:$0xff]   ;;  %v4821_v32 = vld [vmem:[%s5340_s6 + $0x60] sm:$0xff]  }
  0x9d   : > { %4487 = vmatprep.subr.bf16.mxu0 %v4792_v3  ;;  %4628 = vmatprep.subr.bf16.mxu1 %v4792_v3  ;;  %v4820_v31 = vld [vmem:[%s5340_s6 + $0x158] sm:$0xff]   ;;  %v4822_v33 = vld [vmem:[%s5340_s6 + $0x160] sm:$0xff]   ;;  %v4823_v34 = vld [vmem:[%s5340_s6 + $0x68] sm:$0xff]  }
  0x9e   : > { %v4824_v35 = vld [vmem:[%s5340_s6 + $0x168] sm:$0xff]   ;;  %v4825_v36 = vld [vmem:[%s5340_s6 + $0x70] sm:$0xff]   ;;  %v4827_v38 = vld [vmem:[%s5340_s6 + $0x78] sm:$0xff]  }
  0x9f   : > { %v4826_v37 = vld [vmem:[%s5340_s6 + $0x170] sm:$0xff]   ;;  %v4828_v39 = vld [vmem:[%s5340_s6 + $0x178] sm:$0xff]   ;;  %v4829_v40 = vld [vmem:[%s5340_s6 + $0x80] sm:$0xff]  }
  0xa0   : > { %4488 = vmatpush3.bf16.msra.mxu0 %v4792_v3  ;;  %4636 = vmatpush3.bf16.msra.mxu1 %v4792_v3  ;;  %v4830_v41 = vld [vmem:[%s5340_s6 + $0x180] sm:$0xff]   ;;  %v4831_v42 = vld [vmem:[%s5340_s6 + $0x88] sm:$0xff]   ;;  %v4833_v44 = vld [vmem:[%s5340_s6 + $0x90] sm:$0xff]  }
  0xa1   : > { %4489 = vmatprep.subr.bf16.mxu0 %v4793_v6  ;;  %4629 = vmatprep.subr.bf16.mxu1 %v4793_v6  ;;  %v4832_v43 = vld [vmem:[%s5340_s6 + $0x188] sm:$0xff]   ;;  %v4834_v45 = vld [vmem:[%s5340_s6 + $0x190] sm:$0xff]   ;;  %v4835_v46 = vld [vmem:[%s5340_s6 + $0x98] sm:$0xff]  }
  0xa2   : > { %v4836_v47 = vld [vmem:[%s5340_s6 + $0x198] sm:$0xff]   ;;  %v4837_v48 = vld [vmem:[%s5340_s6 + $0xa0] sm:$0xff]   ;;  %v4839_v50 = vld [vmem:[%s5340_s6 + $0xa8] sm:$0xff]  }
  0xa3   : > { %v4838_v49 = vld [vmem:[%s5340_s6 + $0x1a0] sm:$0xff]   ;;  %v4840_v51 = vld [vmem:[%s5340_s6 + $0x1a8] sm:$0xff]   ;;  %v4841_v52 = vld [vmem:[%s5340_s6 + $0xb0] sm:$0xff]  }
  0xa4   : > { %4490 = vmatpush3.bf16.msra.mxu0 %v4793_v6  ;;  %4637 = vmatpush3.bf16.msra.mxu1 %v4793_v6  ;;  %v4842_v53 = vld [vmem:[%s5340_s6 + $0x1b0] sm:$0xff]   ;;  %v4843_v54 = vld [vmem:[%s5340_s6 + $0xb8] sm:$0xff]   ;;  %v4845_v56 = vld [vmem:[%s5340_s6 + $0xc0] sm:$0xff]  }
  0xa5   : > { %4491 = vmatprep.subr.bf16.mxu0 %v4794_v7  ;;  %4630 = vmatprep.subr.bf16.mxu1 %v4794_v7  ;;  %v4844_v55 = vld [vmem:[%s5340_s6 + $0x1b8] sm:$0xff]   ;;  %v4846_v57 = vld [vmem:[%s5340_s6 + $0x1c0] sm:$0xff]   ;;  %v4847_v58 = vld [vmem:[%s5340_s6 + $0xc8] sm:$0xff]  }
  0xa6   : > { %v4848_v59 = vld [vmem:[%s5340_s6 + $0x1c8] sm:$0xff]   ;;  %v4849_v60 = vld [vmem:[%s5340_s6 + $0xd0] sm:$0xff]   ;;  %v4851_v62 = vld [vmem:[%s5340_s6 + $0xd8] sm:$0xff]  }
  0xa7   : > { %v4850_v61 = vld [vmem:[%s5340_s6 + $0x1d0] sm:$0xff]   ;;  %v4852_v63 = vld [vmem:[%s5340_s6 + $0x1d8] sm:$0xff]   ;;  %v4853_v0 = vld [vmem:[%s5340_s6 + $0xe0] sm:$0xff]  }
  0xa8   : > { %4492 = vmatpush3.bf16.msra.mxu0 %v4794_v7  ;;  %4638 = vmatpush3.bf16.msra.mxu1 %v4794_v7  ;;  %v4854_v1 = vld [vmem:[%s5340_s6 + $0x1e0] sm:$0xff]   ;;  %v4855_v2 = vld [vmem:[%s5340_s6 + $0xe8] sm:$0xff]   ;;  %v4857_v4 = vld [vmem:[%s5340_s6 + $0xf0] sm:$0xff]  }
  0xa9   : > { %4493 = vmatprep.subr.bf16.mxu0 %v4795_v8  ;;  %4631 = vmatprep.subr.bf16.mxu1 %v4795_v8  ;;  %v4856_v3 = vld [vmem:[%s5340_s6 + $0x1e8] sm:$0xff]   ;;  %v4858_v5 = vld [vmem:[%s5340_s6 + $0x1f0] sm:$0xff]   ;;  %v4859_v6 = vld [vmem:[%s5340_s6 + $0xf8] sm:$0xff]  }
  0xaa   : > { %v4860_v7 = vld [vmem:[%s5340_s6 + $0x1f8] sm:$0xff]  }
  0xac   : > { %4494 = vmatpush3.bf16.msra.mxu0 %v4795_v8  ;;  %4639 = vmatpush3.bf16.msra.mxu1 %v4795_v8  ;;  %v5418_v8 = vld [vmem:[#allocation7] ss:$0 sm:$0xff] }
  0xad   : > { %4495 = vmatprep.subr.bf16.mxu0 %v4796_v9  ;;  %4632 = vmatprep.subr.bf16.mxu1 %v4796_v9 }
  0xb0   : > { %4496 = vmatpush3.bf16.msra.mxu0 %v4796_v9  ;;  %4640 = vmatpush3.bf16.msra.mxu1 %v4796_v9 }
  0xb3   : > { %4498 = vmatmul.mubr.bf16.vlgmr.msra.gmra.mrb[0].mxu0 %v4799_v10  ;;  %4562 = vmatmul.mubr.bf16.vlgmr.msra.gmra.mrb[0].mxu1 %v4800_v11  ;;  %v5420_v10 = vld [vmem:[#allocation8] ss:$0 sm:$0xff] }
  0xb4   : > { %4501 = vmatprep.mubr.bf16.mxu0 %v4801_v12  ;;  %4565 = vmatprep.mubr.bf16.mxu1 %v4802_v13 }
  0xbb   : > { %4502 = vmatmul.mubr.bf16.gmra.mrb[4].mxu0 %v4803_v14  ;;  %4566 = vmatmul.mubr.bf16.gmra.mrb[4].mxu1 %v4804_v15 }
  0xbc   : > { %4505 = vmatprep.mubr.bf16.mxu0 %v4805_v16  ;;  %4569 = vmatprep.mubr.bf16.mxu1 %v4806_v17 }
  0xc3   : > { %4506 = vmatmul.mubr.bf16.gmra.mrb[8].mxu0 %v4807_v18  ;;  %4570 = vmatmul.mubr.bf16.gmra.mrb[8].mxu1 %v4808_v19 }
  0xc4   : > { %4509 = vmatprep.mubr.bf16.mxu0 %v4809_v20  ;;  %4573 = vmatprep.mubr.bf16.mxu1 %v4810_v21 }
  0xcb   : > { %4510 = vmatmul.mubr.bf16.gmra.mrb[12].mxu0 %v4811_v22  ;;  %4574 = vmatmul.mubr.bf16.gmra.mrb[12].mxu1 %v4812_v23 }
  0xcc   : > { %4513 = vmatprep.mubr.bf16.mxu0 %v4813_v24  ;;  %4577 = vmatprep.mubr.bf16.mxu1 %v4814_v25 }
  0xd3   : > { %4514 = vmatmul.mubr.bf16.gmra.mrb[16].mxu0 %v4815_v26  ;;  %4578 = vmatmul.mubr.bf16.gmra.mrb[16].mxu1 %v4816_v27 }
  0xd4   : > { %4517 = vmatprep.mubr.bf16.mxu0 %v4817_v28  ;;  %4581 = vmatprep.mubr.bf16.mxu1 %v4818_v29 }
  0xdb   : > { %4518 = vmatmul.mubr.bf16.gmra.mrb[20].mxu0 %v4819_v30  ;;  %4582 = vmatmul.mubr.bf16.gmra.mrb[20].mxu1 %v4820_v31 }
  0xdc   : > { %4521 = vmatprep.mubr.bf16.mxu0 %v4821_v32  ;;  %4585 = vmatprep.mubr.bf16.mxu1 %v4822_v33 }
  0xe3   : > { %4522 = vmatmul.mubr.bf16.gmra.mrb[24].mxu0 %v4823_v34  ;;  %4586 = vmatmul.mubr.bf16.gmra.mrb[24].mxu1 %v4824_v35 }
  0xe4   : > { %4525 = vmatprep.mubr.bf16.mxu0 %v4825_v36  ;;  %4589 = vmatprep.mubr.bf16.mxu1 %v4826_v37 }
  0xeb   : > { %4526 = vmatmul.mubr.bf16.gmra.mrb[28].mxu0 %v4827_v38  ;;  %4590 = vmatmul.mubr.bf16.gmra.mrb[28].mxu1 %v4828_v39 }
  0xec   : > { %4529 = vmatprep.mubr.bf16.mxu0 %v4829_v40  ;;  %4593 = vmatprep.mubr.bf16.mxu1 %v4830_v41 }
  0xf3   : > { %4530 = vmatmul.mubr.bf16.gmra.mrb[32].mxu0 %v4831_v42  ;;  %4594 = vmatmul.mubr.bf16.gmra.mrb[32].mxu1 %v4832_v43 }
  0xf4   : > { %4533 = vmatprep.mubr.bf16.mxu0 %v4833_v44  ;;  %4597 = vmatprep.mubr.bf16.mxu1 %v4834_v45 }
  0xfb   : > { %4534 = vmatmul.mubr.bf16.gmra.mrb[36].mxu0 %v4835_v46  ;;  %4598 = vmatmul.mubr.bf16.gmra.mrb[36].mxu1 %v4836_v47 }
  0xfc   : > { %4537 = vmatprep.mubr.bf16.mxu0 %v4837_v48  ;;  %4601 = vmatprep.mubr.bf16.mxu1 %v4838_v49 }
 0x103   : > { %4538 = vmatmul.mubr.bf16.gmra.mrb[40].mxu0 %v4839_v50  ;;  %4602 = vmatmul.mubr.bf16.gmra.mrb[40].mxu1 %v4840_v51 }
 0x104   : > { %4541 = vmatprep.mubr.bf16.mxu0 %v4841_v52  ;;  %4605 = vmatprep.mubr.bf16.mxu1 %v4842_v53 }
 0x10b   : > { %4542 = vmatmul.mubr.bf16.gmra.mrb[44].mxu0 %v4843_v54  ;;  %4606 = vmatmul.mubr.bf16.gmra.mrb[44].mxu1 %v4844_v55 }
 0x10c   : > { %4545 = vmatprep.mubr.bf16.mxu0 %v4845_v56  ;;  %4609 = vmatprep.mubr.bf16.mxu1 %v4846_v57 }
 0x113   : > { %4546 = vmatmul.mubr.bf16.gmra.mrb[48].mxu0 %v4847_v58  ;;  %4610 = vmatmul.mubr.bf16.gmra.mrb[48].mxu1 %v4848_v59 }
 0x114   : > { %4549 = vmatprep.mubr.bf16.mxu0 %v4849_v60  ;;  %4613 = vmatprep.mubr.bf16.mxu1 %v4850_v61 }
 0x11b   : > { %4550 = vmatmul.mubr.bf16.gmra.mrb[52].mxu0 %v4851_v62  ;;  %4614 = vmatmul.mubr.bf16.gmra.mrb[52].mxu1 %v4852_v63 }
 0x11c   : > { %4553 = vmatprep.mubr.bf16.mxu0 %v4853_v0  ;;  %4617 = vmatprep.mubr.bf16.mxu1 %v4854_v1 }
 0x123   : > { %4554 = vmatmul.mubr.bf16.gmra.mrb[56].mxu0 %v4855_v2  ;;  %4618 = vmatmul.mubr.bf16.gmra.mrb[56].mxu1 %v4856_v3 }
 0x124   : > { %4557 = vmatprep.mubr.bf16.mxu0 %v4857_v4  ;;  %4621 = vmatprep.mubr.bf16.mxu1 %v4858_v5 }
 0x12b   : > { %4558 = vmatmul.mubr.bf16.gmra.mrb[60].mxu0 %v4859_v6  ;;  %4622 = vmatmul.mubr.bf16.gmra.mrb[60].mxu1 %v4860_v7 }
 0x186   : > { %v4499_v9 = vpop.f32.mrb[0].mxu0  ;;  %v4563_v11 = vpop.f32.mrb[0].mxu1 }
 0x187   : > { %v2096_v12 = vmul.f32 %v4499_v9, %v5418_v8  ;;  %v2160_v13 = vmul.f32 %v4563_v11, %v5418_v8  ;;  %v1189_v14 = vpop.f32.mrb[1].mxu0  ;;  %v1445_v15 = vpop.f32.mrb[1].mxu1 }
 0x188   : > { %v2094_v16 = vmul.f32 %v5418_v8, %v1189_v14  ;;  %v2158_v17 = vmul.f32 %v5418_v8, %v1445_v15  ;;  %v4500_v18 = vpop.f32.mrb[2].mxu0  ;;  %v4564_v19 = vpop.f32.mrb[2].mxu1 }
 0x189   : > { %v2231_v20 = vadd.f32 %v5420_v10, %v2096_v12  ;;  %v2295_v21 = vadd.f32 %v5420_v10, %v2160_v13  ;;  %v2097_v22 = vmul.f32 %v4500_v18, %v5418_v8  ;;  %v2161_v23 = vmul.f32 %v4564_v19, %v5418_v8  ;;  %v1192_v24 = vpop.f32.mrb[3].mxu0  ;;  %v1448_v25 = vpop.f32.mrb[3].mxu1 }
 0x18a   : > { %v2229_v26 = vadd.f32 %v5420_v10, %v2094_v16  ;;  %v2293_v27 = vadd.f32 %v5420_v10, %v2158_v17  ;;  %v2095_v28 = vmul.f32 %v5418_v8, %v1192_v24  ;;  %v2159_v29 = vmul.f32 %v5418_v8, %v1448_v25 }
 0x18b   : > { %v2232_v30 = vadd.f32 %v5420_v10, %v2097_v22  ;;  %v2296_v31 = vadd.f32 %v5420_v10, %v2161_v23  ;;  %v2359_v34 = vmax.f32 %v2231_v20, 0.0  ;;  %v2423_v35 = vmax.f32 %v2295_v21, 0.0 }
 0x18c   : > { %v2230_v32 = vadd.f32 %v5420_v10, %v2095_v28  ;;  %v2294_v33 = vadd.f32 %v5420_v10, %v2159_v29  ;;  %v2357_v38 = vmax.f32 %v2229_v26, 0.0  ;;  %v2421_v39 = vmax.f32 %v2293_v27, 0.0 }
 0x18d   : > { %v2360_v36 = vmax.f32 %v2232_v30, 0.0  ;;  %v2424_v37 = vmax.f32 %v2296_v31, 0.0 }
 0x18e   : > { %v2358_v40 = vmax.f32 %v2230_v32, 0.0  ;;  %v2422_v41 = vmax.f32 %v2294_v33, 0.0  ;;  %v4503_v42 = vpop.f32.mrb[4].mxu0  ;;  %v4567_v43 = vpop.f32.mrb[4].mxu1 }
 0x18f   : > { %v4034_v44 = vpack.c.bf16 %v2360_v36, %v2359_v34  ;;  %v4194_v45 = vpack.c.bf16 %v2424_v37, %v2423_v35  ;;  %v2100_v46 = vmul.f32 %v4503_v42, %v5418_v8  ;;  %v2164_v47 = vmul.f32 %v4567_v43, %v5418_v8  ;;  %v1205_v48 = vpop.f32.mrb[5].mxu0  ;;  %v1461_v49 = vpop.f32.mrb[5].mxu1 }
 0x190   : > { %v4029_v50 = vpack.c.bf16 %v2358_v40, %v2357_v38  ;;  %v4189_v51 = vpack.c.bf16 %v2422_v41, %v2421_v39  ;;  %v2098_v52 = vmul.f32 %v5418_v8, %v1205_v48  ;;  %v2162_v53 = vmul.f32 %v5418_v8, %v1461_v49  ;;  %v4504_v54 = vpop.f32.mrb[6].mxu0  ;;  %v4568_v55 = vpop.f32.mrb[6].mxu1 }
 0x191   : > { %4346 = vst [vmem:[%s5443_s26 + $0x8] sm:$0xff] %v4034_v44   ;;  %4378 = vst [vmem:[%s5443_s26 + $0x108] sm:$0xff] %v4194_v45   ;;  %v2235_v56 = vadd.f32 %v5420_v10, %v2100_v46  ;;  %v2299_v57 = vadd.f32 %v5420_v10, %v2164_v47  ;;  %v2101_v58 = vmul.f32 %v4504_v54, %v5418_v8  ;;  %v1208_v60 = vpop.f32.mrb[7].mxu0  ;;  %v1464_v61 = vpop.f32.mrb[7].mxu1 }
 0x192   : > { %v2165_v59 = vmul.f32 %v4568_v55, %v5418_v8  ;;  %4030 = vst [vmem:[%s5443_s26] sm:$0xff] %v4029_v50   ;;  %4377 = vst [vmem:[%s5443_s26 + $0x100] sm:$0xff] %v4189_v51   ;;  %v2233_v62 = vadd.f32 %v5420_v10, %v2098_v52  ;;  %v2297_v63 = vadd.f32 %v5420_v10, %v2162_v53 }
 0x193   : > { %v2099_v0 = vmul.f32 %v5418_v8, %v1208_v60  ;;  %v2163_v1 = vmul.f32 %v5418_v8, %v1464_v61  ;;  %v2236_v2 = vadd.f32 %v5420_v10, %v2101_v58  ;;  %v2363_v6 = vmax.f32 %v2235_v56, 0.0 }
 0x194   : > { %v2300_v3 = vadd.f32 %v5420_v10, %v2165_v59  ;;  %v2427_v7 = vmax.f32 %v2299_v57, 0.0  ;;  %v2361_v12 = vmax.f32 %v2233_v62, 0.0  ;;  %v2425_v13 = vmax.f32 %v2297_v63, 0.0 }
 0x195   : > { %v2234_v4 = vadd.f32 %v5420_v10, %v2099_v0  ;;  %v2298_v5 = vadd.f32 %v5420_v10, %v2163_v1  ;;  %v2364_v9 = vmax.f32 %v2236_v2, 0.0 }
 0x196   : > { %v2428_v11 = vmax.f32 %v2300_v3, 0.0  ;;  %v4507_v16 = vpop.f32.mrb[8].mxu0  ;;  %v4571_v17 = vpop.f32.mrb[8].mxu1 }
 0x197   : > { %v2362_v14 = vmax.f32 %v2234_v4, 0.0  ;;  %v2426_v15 = vmax.f32 %v2298_v5, 0.0  ;;  %v4044_v18 = vpack.c.bf16 %v2364_v9, %v2363_v6  ;;  %v2104_v20 = vmul.f32 %v4507_v16, %v5418_v8  ;;  %v1221_v22 = vpop.f32.mrb[9].mxu0  ;;  %v1477_v23 = vpop.f32.mrb[9].mxu1 }
 0x198   : > { %v4204_v19 = vpack.c.bf16 %v2428_v11, %v2427_v7  ;;  %v2168_v21 = vmul.f32 %v4571_v17, %v5418_v8  ;;  %v2102_v26 = vmul.f32 %v5418_v8, %v1221_v22  ;;  %v2166_v27 = vmul.f32 %v5418_v8, %v1477_v23  ;;  %v4508_v28 = vpop.f32.mrb[10].mxu0  ;;  %v4572_v29 = vpop.f32.mrb[10].mxu1 }
 0x199   : > { %v4039_v24 = vpack.c.bf16 %v2362_v14, %v2361_v12  ;;  %v4199_v25 = vpack.c.bf16 %v2426_v15, %v2425_v13  ;;  %4348 = vst [vmem:[%s5443_s26 + $0x18] sm:$0xff] %v4044_v18   ;;  %v2239_v30 = vadd.f32 %v5420_v10, %v2104_v20  ;;  %v2105_v32 = vmul.f32 %v4508_v28, %v5418_v8  ;;  %v1224_v34 = vpop.f32.mrb[11].mxu0  ;;  %v1480_v35 = vpop.f32.mrb[11].mxu1 }
 0x19a   : > { %4380 = vst [vmem:[%s5443_s26 + $0x118] sm:$0xff] %v4204_v19   ;;  %v2303_v31 = vadd.f32 %v5420_v10, %v2168_v21  ;;  %v2169_v33 = vmul.f32 %v4572_v29, %v5418_v8  ;;  %v2237_v36 = vadd.f32 %v5420_v10, %v2102_v26  ;;  %v2301_v37 = vadd.f32 %v5420_v10, %v2166_v27 }
 0x19b   : > { %4347 = vst [vmem:[%s5443_s26 + $0x10] sm:$0xff] %v4039_v24   ;;  %4379 = vst [vmem:[%s5443_s26 + $0x110] sm:$0xff] %v4199_v25   ;;  %v2103_v38 = vmul.f32 %v5418_v8, %v1224_v34  ;;  %v2167_v39 = vmul.f32 %v5418_v8, %v1480_v35  ;;  %v2240_v40 = vadd.f32 %v5420_v10, %v2105_v32  ;;  %v2367_v44 = vmax.f32 %v2239_v30, 0.0 }
 0x19c   : > { %v2304_v41 = vadd.f32 %v5420_v10, %v2169_v33  ;;  %v2431_v45 = vmax.f32 %v2303_v31, 0.0  ;;  %v2365_v48 = vmax.f32 %v2237_v36, 0.0  ;;  %v2429_v49 = vmax.f32 %v2301_v37, 0.0 }
 0x19d   : > { %v2238_v42 = vadd.f32 %v5420_v10, %v2103_v38  ;;  %v2302_v43 = vadd.f32 %v5420_v10, %v2167_v39  ;;  %v2368_v46 = vmax.f32 %v2240_v40, 0.0 }
 0x19e   : > { %v2432_v47 = vmax.f32 %v2304_v41, 0.0  ;;  %v4511_v52 = vpop.f32.mrb[12].mxu0  ;;  %v4575_v53 = vpop.f32.mrb[12].mxu1 }
 0x19f   : > { %v2366_v50 = vmax.f32 %v2238_v42, 0.0  ;;  %v2430_v51 = vmax.f32 %v2302_v43, 0.0  ;;  %v4054_v54 = vpack.c.bf16 %v2368_v46, %v2367_v44  ;;  %v2108_v56 = vmul.f32 %v4511_v52, %v5418_v8  ;;  %v1237_v58 = vpop.f32.mrb[13].mxu0  ;;  %v1493_v59 = vpop.f32.mrb[13].mxu1 }
 0x1a0   : > { %v4214_v55 = vpack.c.bf16 %v2432_v47, %v2431_v45  ;;  %v2172_v57 = vmul.f32 %v4575_v53, %v5418_v8  ;;  %v2106_v62 = vmul.f32 %v5418_v8, %v1237_v58  ;;  %v2170_v63 = vmul.f32 %v5418_v8, %v1493_v59  ;;  %v4512_v0 = vpop.f32.mrb[14].mxu0  ;;  %v4576_v1 = vpop.f32.mrb[14].mxu1 }
 0x1a1   : > { %v4049_v60 = vpack.c.bf16 %v2366_v50, %v2365_v48  ;;  %v4209_v61 = vpack.c.bf16 %v2430_v51, %v2429_v49  ;;  %4350 = vst [vmem:[%s5443_s26 + $0x28] sm:$0xff] %v4054_v54   ;;  %v2243_v2 = vadd.f32 %v5420_v10, %v2108_v56  ;;  %v2109_v4 = vmul.f32 %v4512_v0, %v5418_v8  ;;  %v1240_v6 = vpop.f32.mrb[15].mxu0  ;;  %v1496_v7 = vpop.f32.mrb[15].mxu1 }
 0x1a2   : > { %4382 = vst [vmem:[%s5443_s26 + $0x128] sm:$0xff] %v4214_v55   ;;  %v2307_v3 = vadd.f32 %v5420_v10, %v2172_v57  ;;  %v2173_v5 = vmul.f32 %v4576_v1, %v5418_v8  ;;  %v2241_v9 = vadd.f32 %v5420_v10, %v2106_v62  ;;  %v2305_v11 = vadd.f32 %v5420_v10, %v2170_v63 }
 0x1a3   : > { %4349 = vst [vmem:[%s5443_s26 + $0x20] sm:$0xff] %v4049_v60   ;;  %4381 = vst [vmem:[%s5443_s26 + $0x120] sm:$0xff] %v4209_v61   ;;  %v2107_v12 = vmul.f32 %v5418_v8, %v1240_v6  ;;  %v2171_v13 = vmul.f32 %v5418_v8, %v1496_v7  ;;  %v2244_v14 = vadd.f32 %v5420_v10, %v2109_v4  ;;  %v2371_v18 = vmax.f32 %v2243_v2, 0.0 }
 0x1a4   : > { %v2308_v15 = vadd.f32 %v5420_v10, %v2173_v5  ;;  %v2435_v19 = vmax.f32 %v2307_v3, 0.0  ;;  %v2369_v22 = vmax.f32 %v2241_v9, 0.0  ;;  %v2433_v23 = vmax.f32 %v2305_v11, 0.0 }
 0x1a5   : > { %v2242_v16 = vadd.f32 %v5420_v10, %v2107_v12  ;;  %v2306_v17 = vadd.f32 %v5420_v10, %v2171_v13  ;;  %v2372_v20 = vmax.f32 %v2244_v14, 0.0 }
 0x1a6   : > { %v2436_v21 = vmax.f32 %v2308_v15, 0.0  ;;  %v4515_v26 = vpop.f32.mrb[16].mxu0  ;;  %v4579_v27 = vpop.f32.mrb[16].mxu1 }
 0x1a7   : > { %v2370_v24 = vmax.f32 %v2242_v16, 0.0  ;;  %v2434_v25 = vmax.f32 %v2306_v17, 0.0  ;;  %v4064_v28 = vpack.c.bf16 %v2372_v20, %v2371_v18  ;;  %v2112_v30 = vmul.f32 %v4515_v26, %v5418_v8  ;;  %v1253_v32 = vpop.f32.mrb[17].mxu0  ;;  %v1509_v33 = vpop.f32.mrb[17].mxu1 }
 0x1a8   : > { %v4224_v29 = vpack.c.bf16 %v2436_v21, %v2435_v19  ;;  %v2176_v31 = vmul.f32 %v4579_v27, %v5418_v8  ;;  %v2110_v36 = vmul.f32 %v5418_v8, %v1253_v32  ;;  %v2174_v37 = vmul.f32 %v5418_v8, %v1509_v33  ;;  %v4516_v38 = vpop.f32.mrb[18].mxu0  ;;  %v4580_v39 = vpop.f32.mrb[18].mxu1 }
 0x1a9   : > { %v4059_v34 = vpack.c.bf16 %v2370_v24, %v2369_v22  ;;  %v4219_v35 = vpack.c.bf16 %v2434_v25, %v2433_v23  ;;  %4352 = vst [vmem:[%s5443_s26 + $0x38] sm:$0xff] %v4064_v28   ;;  %v2247_v40 = vadd.f32 %v5420_v10, %v2112_v30  ;;  %v2113_v42 = vmul.f32 %v4516_v38, %v5418_v8  ;;  %v1256_v44 = vpop.f32.mrb[19].mxu0  ;;  %v1512_v45 = vpop.f32.mrb[19].mxu1 }
 0x1aa   : > { %4384 = vst [vmem:[%s5443_s26 + $0x138] sm:$0xff] %v4224_v29   ;;  %v2311_v41 = vadd.f32 %v5420_v10, %v2176_v31  ;;  %v2177_v43 = vmul.f32 %v4580_v39, %v5418_v8  ;;  %v2245_v46 = vadd.f32 %v5420_v10, %v2110_v36  ;;  %v2309_v47 = vadd.f32 %v5420_v10, %v2174_v37 }
 0x1ab   : > { %4351 = vst [vmem:[%s5443_s26 + $0x30] sm:$0xff] %v4059_v34   ;;  %4383 = vst [vmem:[%s5443_s26 + $0x130] sm:$0xff] %v4219_v35   ;;  %v2111_v48 = vmul.f32 %v5418_v8, %v1256_v44  ;;  %v2175_v49 = vmul.f32 %v5418_v8, %v1512_v45  ;;  %v2248_v50 = vadd.f32 %v5420_v10, %v2113_v42  ;;  %v2375_v54 = vmax.f32 %v2247_v40, 0.0 }
 0x1ac   : > { %v2312_v51 = vadd.f32 %v5420_v10, %v2177_v43  ;;  %v2439_v55 = vmax.f32 %v2311_v41, 0.0  ;;  %v2373_v58 = vmax.f32 %v2245_v46, 0.0  ;;  %v2437_v59 = vmax.f32 %v2309_v47, 0.0 }
 0x1ad   : > { %v2246_v52 = vadd.f32 %v5420_v10, %v2111_v48  ;;  %v2310_v53 = vadd.f32 %v5420_v10, %v2175_v49  ;;  %v2376_v56 = vmax.f32 %v2248_v50, 0.0 }
 0x1ae   : > { %v2440_v57 = vmax.f32 %v2312_v51, 0.0  ;;  %v4519_v62 = vpop.f32.mrb[20].mxu0  ;;  %v4583_v63 = vpop.f32.mrb[20].mxu1 }
 0x1af   : > { %v2374_v60 = vmax.f32 %v2246_v52, 0.0  ;;  %v2438_v61 = vmax.f32 %v2310_v53, 0.0  ;;  %v4074_v0 = vpack.c.bf16 %v2376_v56, %v2375_v54  ;;  %v2116_v2 = vmul.f32 %v4519_v62, %v5418_v8  ;;  %v1269_v4 = vpop.f32.mrb[21].mxu0  ;;  %v1525_v5 = vpop.f32.mrb[21].mxu1 }
 0x1b0   : > { %v4234_v1 = vpack.c.bf16 %v2440_v57, %v2439_v55  ;;  %v2180_v3 = vmul.f32 %v4583_v63, %v5418_v8  ;;  %v2114_v9 = vmul.f32 %v5418_v8, %v1269_v4  ;;  %v2178_v11 = vmul.f32 %v5418_v8, %v1525_v5  ;;  %v4520_v12 = vpop.f32.mrb[22].mxu0  ;;  %v4584_v13 = vpop.f32.mrb[22].mxu1 }
 0x1b1   : > { %v4069_v6 = vpack.c.bf16 %v2374_v60, %v2373_v58  ;;  %v4229_v7 = vpack.c.bf16 %v2438_v61, %v2437_v59  ;;  %4354 = vst [vmem:[%s5443_s26 + $0x48] sm:$0xff] %v4074_v0   ;;  %v2251_v14 = vadd.f32 %v5420_v10, %v2116_v2  ;;  %v2117_v16 = vmul.f32 %v4520_v12, %v5418_v8  ;;  %v1272_v18 = vpop.f32.mrb[23].mxu0  ;;  %v1528_v19 = vpop.f32.mrb[23].mxu1 }
 0x1b2   : > { %4386 = vst [vmem:[%s5443_s26 + $0x148] sm:$0xff] %v4234_v1   ;;  %v2315_v15 = vadd.f32 %v5420_v10, %v2180_v3  ;;  %v2181_v17 = vmul.f32 %v4584_v13, %v5418_v8  ;;  %v2249_v20 = vadd.f32 %v5420_v10, %v2114_v9  ;;  %v2313_v21 = vadd.f32 %v5420_v10, %v2178_v11 }
 0x1b3   : > { %4353 = vst [vmem:[%s5443_s26 + $0x40] sm:$0xff] %v4069_v6   ;;  %4385 = vst [vmem:[%s5443_s26 + $0x140] sm:$0xff] %v4229_v7   ;;  %v2115_v22 = vmul.f32 %v5418_v8, %v1272_v18  ;;  %v2179_v23 = vmul.f32 %v5418_v8, %v1528_v19  ;;  %v2252_v24 = vadd.f32 %v5420_v10, %v2117_v16  ;;  %v2379_v28 = vmax.f32 %v2251_v14, 0.0 }
 0x1b4   : > { %v2316_v25 = vadd.f32 %v5420_v10, %v2181_v17  ;;  %v2443_v29 = vmax.f32 %v2315_v15, 0.0  ;;  %v2377_v32 = vmax.f32 %v2249_v20, 0.0  ;;  %v2441_v33 = vmax.f32 %v2313_v21, 0.0 }
 0x1b5   : > { %v2250_v26 = vadd.f32 %v5420_v10, %v2115_v22  ;;  %v2314_v27 = vadd.f32 %v5420_v10, %v2179_v23  ;;  %v2380_v30 = vmax.f32 %v2252_v24, 0.0 }
 0x1b6   : > { %v2444_v31 = vmax.f32 %v2316_v25, 0.0  ;;  %v4523_v36 = vpop.f32.mrb[24].mxu0  ;;  %v4587_v37 = vpop.f32.mrb[24].mxu1 }
 0x1b7   : > { %v2378_v34 = vmax.f32 %v2250_v26, 0.0  ;;  %v2442_v35 = vmax.f32 %v2314_v27, 0.0  ;;  %v4084_v38 = vpack.c.bf16 %v2380_v30, %v2379_v28  ;;  %v2120_v40 = vmul.f32 %v4523_v36, %v5418_v8  ;;  %v1285_v42 = vpop.f32.mrb[25].mxu0  ;;  %v1541_v43 = vpop.f32.mrb[25].mxu1 }
 0x1b8   : > { %v4244_v39 = vpack.c.bf16 %v2444_v31, %v2443_v29  ;;  %v2184_v41 = vmul.f32 %v4587_v37, %v5418_v8  ;;  %v2118_v46 = vmul.f32 %v5418_v8, %v1285_v42  ;;  %v2182_v47 = vmul.f32 %v5418_v8, %v1541_v43  ;;  %v4524_v48 = vpop.f32.mrb[26].mxu0  ;;  %v4588_v49 = vpop.f32.mrb[26].mxu1 }
 0x1b9   : > { %v4079_v44 = vpack.c.bf16 %v2378_v34, %v2377_v32  ;;  %v4239_v45 = vpack.c.bf16 %v2442_v35, %v2441_v33  ;;  %4356 = vst [vmem:[%s5443_s26 + $0x58] sm:$0xff] %v4084_v38   ;;  %v2255_v50 = vadd.f32 %v5420_v10, %v2120_v40  ;;  %v2121_v52 = vmul.f32 %v4524_v48, %v5418_v8  ;;  %v1288_v54 = vpop.f32.mrb[27].mxu0  ;;  %v1544_v55 = vpop.f32.mrb[27].mxu1 }
 0x1ba   : > { %4388 = vst [vmem:[%s5443_s26 + $0x158] sm:$0xff] %v4244_v39   ;;  %v2319_v51 = vadd.f32 %v5420_v10, %v2184_v41  ;;  %v2185_v53 = vmul.f32 %v4588_v49, %v5418_v8  ;;  %v2253_v56 = vadd.f32 %v5420_v10, %v2118_v46  ;;  %v2317_v57 = vadd.f32 %v5420_v10, %v2182_v47 }
 0x1bb   : > { %4355 = vst [vmem:[%s5443_s26 + $0x50] sm:$0xff] %v4079_v44   ;;  %4387 = vst [vmem:[%s5443_s26 + $0x150] sm:$0xff] %v4239_v45   ;;  %v2119_v58 = vmul.f32 %v5418_v8, %v1288_v54  ;;  %v2183_v59 = vmul.f32 %v5418_v8, %v1544_v55  ;;  %v2256_v60 = vadd.f32 %v5420_v10, %v2121_v52  ;;  %v2383_v0 = vmax.f32 %v2255_v50, 0.0 }
 0x1bc   : > { %v2320_v61 = vadd.f32 %v5420_v10, %v2185_v53  ;;  %v2447_v1 = vmax.f32 %v2319_v51, 0.0  ;;  %v2381_v4 = vmax.f32 %v2253_v56, 0.0  ;;  %v2445_v5 = vmax.f32 %v2317_v57, 0.0 }
 0x1bd   : > { %v2254_v62 = vadd.f32 %v5420_v10, %v2119_v58  ;;  %v2318_v63 = vadd.f32 %v5420_v10, %v2183_v59  ;;  %v2384_v2 = vmax.f32 %v2256_v60, 0.0 }
 0x1be   : > { %v2448_v3 = vmax.f32 %v2320_v61, 0.0  ;;  %v4527_v9 = vpop.f32.mrb[28].mxu0  ;;  %v4591_v11 = vpop.f32.mrb[28].mxu1 }
 0x1bf   : > { %v2382_v6 = vmax.f32 %v2254_v62, 0.0  ;;  %v2446_v7 = vmax.f32 %v2318_v63, 0.0  ;;  %v4094_v12 = vpack.c.bf16 %v2384_v2, %v2383_v0  ;;  %v2124_v14 = vmul.f32 %v4527_v9, %v5418_v8  ;;  %v1301_v16 = vpop.f32.mrb[29].mxu0  ;;  %v1557_v17 = vpop.f32.mrb[29].mxu1 }
 0x1c0   : > { %v4254_v13 = vpack.c.bf16 %v2448_v3, %v2447_v1  ;;  %v2188_v15 = vmul.f32 %v4591_v11, %v5418_v8  ;;  %v2122_v20 = vmul.f32 %v5418_v8, %v1301_v16  ;;  %v2186_v21 = vmul.f32 %v5418_v8, %v1557_v17  ;;  %v4528_v22 = vpop.f32.mrb[30].mxu0  ;;  %v4592_v23 = vpop.f32.mrb[30].mxu1 }
 0x1c1   : > { %v4089_v18 = vpack.c.bf16 %v2382_v6, %v2381_v4  ;;  %v4249_v19 = vpack.c.bf16 %v2446_v7, %v2445_v5  ;;  %4358 = vst [vmem:[%s5443_s26 + $0x68] sm:$0xff] %v4094_v12   ;;  %v2259_v24 = vadd.f32 %v5420_v10, %v2124_v14  ;;  %v2125_v26 = vmul.f32 %v4528_v22, %v5418_v8  ;;  %v1304_v28 = vpop.f32.mrb[31].mxu0  ;;  %v1560_v29 = vpop.f32.mrb[31].mxu1 }
 0x1c2   : > { %4390 = vst [vmem:[%s5443_s26 + $0x168] sm:$0xff] %v4254_v13   ;;  %v2323_v25 = vadd.f32 %v5420_v10, %v2188_v15  ;;  %v2189_v27 = vmul.f32 %v4592_v23, %v5418_v8  ;;  %v2257_v30 = vadd.f32 %v5420_v10, %v2122_v20  ;;  %v2321_v31 = vadd.f32 %v5420_v10, %v2186_v21 }
 0x1c3   : > { %4357 = vst [vmem:[%s5443_s26 + $0x60] sm:$0xff] %v4089_v18   ;;  %4389 = vst [vmem:[%s5443_s26 + $0x160] sm:$0xff] %v4249_v19   ;;  %v2123_v32 = vmul.f32 %v5418_v8, %v1304_v28  ;;  %v2187_v33 = vmul.f32 %v5418_v8, %v1560_v29  ;;  %v2260_v34 = vadd.f32 %v5420_v10, %v2125_v26  ;;  %v2387_v38 = vmax.f32 %v2259_v24, 0.0 }
 0x1c4   : > { %v2324_v35 = vadd.f32 %v5420_v10, %v2189_v27  ;;  %v2451_v39 = vmax.f32 %v2323_v25, 0.0  ;;  %v2385_v42 = vmax.f32 %v2257_v30, 0.0  ;;  %v2449_v43 = vmax.f32 %v2321_v31, 0.0 }
 0x1c5   : > { %v2258_v36 = vadd.f32 %v5420_v10, %v2123_v32  ;;  %v2322_v37 = vadd.f32 %v5420_v10, %v2187_v33  ;;  %v2388_v40 = vmax.f32 %v2260_v34, 0.0 }
 0x1c6   : > { %v2452_v41 = vmax.f32 %v2324_v35, 0.0  ;;  %v4531_v46 = vpop.f32.mrb[32].mxu0  ;;  %v4595_v47 = vpop.f32.mrb[32].mxu1 }
 0x1c7   : > { %v2386_v44 = vmax.f32 %v2258_v36, 0.0  ;;  %v2450_v45 = vmax.f32 %v2322_v37, 0.0  ;;  %v4104_v48 = vpack.c.bf16 %v2388_v40, %v2387_v38  ;;  %v2128_v50 = vmul.f32 %v4531_v46, %v5418_v8  ;;  %v1317_v52 = vpop.f32.mrb[33].mxu0  ;;  %v1573_v53 = vpop.f32.mrb[33].mxu1 }
 0x1c8   : > { %v4264_v49 = vpack.c.bf16 %v2452_v41, %v2451_v39  ;;  %v2192_v51 = vmul.f32 %v4595_v47, %v5418_v8  ;;  %v2126_v56 = vmul.f32 %v5418_v8, %v1317_v52  ;;  %v2190_v57 = vmul.f32 %v5418_v8, %v1573_v53  ;;  %v4532_v58 = vpop.f32.mrb[34].mxu0  ;;  %v4596_v59 = vpop.f32.mrb[34].mxu1 }
 0x1c9   : > { %v4099_v54 = vpack.c.bf16 %v2386_v44, %v2385_v42  ;;  %v4259_v55 = vpack.c.bf16 %v2450_v45, %v2449_v43  ;;  %4360 = vst [vmem:[%s5443_s26 + $0x78] sm:$0xff] %v4104_v48   ;;  %v2263_v60 = vadd.f32 %v5420_v10, %v2128_v50  ;;  %v2129_v62 = vmul.f32 %v4532_v58, %v5418_v8  ;;  %v1320_v0 = vpop.f32.mrb[35].mxu0  ;;  %v1576_v1 = vpop.f32.mrb[35].mxu1 }
 0x1ca   : > { %4392 = vst [vmem:[%s5443_s26 + $0x178] sm:$0xff] %v4264_v49   ;;  %v2327_v61 = vadd.f32 %v5420_v10, %v2192_v51  ;;  %v2193_v63 = vmul.f32 %v4596_v59, %v5418_v8  ;;  %v2261_v2 = vadd.f32 %v5420_v10, %v2126_v56  ;;  %v2325_v3 = vadd.f32 %v5420_v10, %v2190_v57 }
 0x1cb   : > { %4359 = vst [vmem:[%s5443_s26 + $0x70] sm:$0xff] %v4099_v54   ;;  %4391 = vst [vmem:[%s5443_s26 + $0x170] sm:$0xff] %v4259_v55   ;;  %v2127_v4 = vmul.f32 %v5418_v8, %v1320_v0  ;;  %v2191_v5 = vmul.f32 %v5418_v8, %v1576_v1  ;;  %v2264_v6 = vadd.f32 %v5420_v10, %v2129_v62  ;;  %v2391_v12 = vmax.f32 %v2263_v60, 0.0 }
 0x1cc   : > { %v2328_v7 = vadd.f32 %v5420_v10, %v2193_v63  ;;  %v2455_v13 = vmax.f32 %v2327_v61, 0.0  ;;  %v2389_v16 = vmax.f32 %v2261_v2, 0.0  ;;  %v2453_v17 = vmax.f32 %v2325_v3, 0.0 }
 0x1cd   : > { %v2262_v9 = vadd.f32 %v5420_v10, %v2127_v4  ;;  %v2326_v11 = vadd.f32 %v5420_v10, %v2191_v5  ;;  %v2392_v14 = vmax.f32 %v2264_v6, 0.0 }
 0x1ce   : > { %v2456_v15 = vmax.f32 %v2328_v7, 0.0  ;;  %v4535_v20 = vpop.f32.mrb[36].mxu0  ;;  %v4599_v21 = vpop.f32.mrb[36].mxu1 }
 0x1cf   : > { %v2390_v18 = vmax.f32 %v2262_v9, 0.0  ;;  %v2454_v19 = vmax.f32 %v2326_v11, 0.0  ;;  %v4114_v22 = vpack.c.bf16 %v2392_v14, %v2391_v12  ;;  %v2132_v24 = vmul.f32 %v4535_v20, %v5418_v8  ;;  %v1333_v26 = vpop.f32.mrb[37].mxu0  ;;  %v1589_v27 = vpop.f32.mrb[37].mxu1 }
 0x1d0   : > { %v4274_v23 = vpack.c.bf16 %v2456_v15, %v2455_v13  ;;  %v2196_v25 = vmul.f32 %v4599_v21, %v5418_v8  ;;  %v2130_v30 = vmul.f32 %v5418_v8, %v1333_v26  ;;  %v2194_v31 = vmul.f32 %v5418_v8, %v1589_v27  ;;  %v4536_v32 = vpop.f32.mrb[38].mxu0  ;;  %v4600_v33 = vpop.f32.mrb[38].mxu1 }
 0x1d1   : > { %v4109_v28 = vpack.c.bf16 %v2390_v18, %v2389_v16  ;;  %v4269_v29 = vpack.c.bf16 %v2454_v19, %v2453_v17  ;;  %4362 = vst [vmem:[%s5443_s26 + $0x88] sm:$0xff] %v4114_v22   ;;  %v2267_v34 = vadd.f32 %v5420_v10, %v2132_v24  ;;  %v2133_v36 = vmul.f32 %v4536_v32, %v5418_v8  ;;  %v1336_v38 = vpop.f32.mrb[39].mxu0  ;;  %v1592_v39 = vpop.f32.mrb[39].mxu1 }
 0x1d2   : > { %4394 = vst [vmem:[%s5443_s26 + $0x188] sm:$0xff] %v4274_v23   ;;  %v2331_v35 = vadd.f32 %v5420_v10, %v2196_v25  ;;  %v2197_v37 = vmul.f32 %v4600_v33, %v5418_v8  ;;  %v2265_v40 = vadd.f32 %v5420_v10, %v2130_v30  ;;  %v2329_v41 = vadd.f32 %v5420_v10, %v2194_v31 }
 0x1d3   : > { %4361 = vst [vmem:[%s5443_s26 + $0x80] sm:$0xff] %v4109_v28   ;;  %4393 = vst [vmem:[%s5443_s26 + $0x180] sm:$0xff] %v4269_v29   ;;  %v2131_v42 = vmul.f32 %v5418_v8, %v1336_v38  ;;  %v2195_v43 = vmul.f32 %v5418_v8, %v1592_v39  ;;  %v2268_v44 = vadd.f32 %v5420_v10, %v2133_v36  ;;  %v2395_v48 = vmax.f32 %v2267_v34, 0.0 }
 0x1d4   : > { %v2332_v45 = vadd.f32 %v5420_v10, %v2197_v37  ;;  %v2459_v49 = vmax.f32 %v2331_v35, 0.0  ;;  %v2393_v52 = vmax.f32 %v2265_v40, 0.0  ;;  %v2457_v53 = vmax.f32 %v2329_v41, 0.0 }
 0x1d5   : > { %v2266_v46 = vadd.f32 %v5420_v10, %v2131_v42  ;;  %v2330_v47 = vadd.f32 %v5420_v10, %v2195_v43  ;;  %v2396_v50 = vmax.f32 %v2268_v44, 0.0 }
 0x1d6   : > { %v2460_v51 = vmax.f32 %v2332_v45, 0.0  ;;  %v4539_v56 = vpop.f32.mrb[40].mxu0  ;;  %v4603_v57 = vpop.f32.mrb[40].mxu1 }
 0x1d7   : > { %v2394_v54 = vmax.f32 %v2266_v46, 0.0  ;;  %v2458_v55 = vmax.f32 %v2330_v47, 0.0  ;;  %v4124_v58 = vpack.c.bf16 %v2396_v50, %v2395_v48  ;;  %v2136_v60 = vmul.f32 %v4539_v56, %v5418_v8  ;;  %v1349_v62 = vpop.f32.mrb[41].mxu0  ;;  %v1605_v63 = vpop.f32.mrb[41].mxu1 }
 0x1d8   : > { %v4284_v59 = vpack.c.bf16 %v2460_v51, %v2459_v49  ;;  %v2200_v61 = vmul.f32 %v4603_v57, %v5418_v8  ;;  %v2134_v2 = vmul.f32 %v5418_v8, %v1349_v62  ;;  %v2198_v3 = vmul.f32 %v5418_v8, %v1605_v63  ;;  %v4540_v4 = vpop.f32.mrb[42].mxu0  ;;  %v4604_v5 = vpop.f32.mrb[42].mxu1 }
 0x1d9   : > { %v4119_v0 = vpack.c.bf16 %v2394_v54, %v2393_v52  ;;  %v4279_v1 = vpack.c.bf16 %v2458_v55, %v2457_v53  ;;  %4364 = vst [vmem:[%s5443_s26 + $0x98] sm:$0xff] %v4124_v58   ;;  %v2271_v6 = vadd.f32 %v5420_v10, %v2136_v60  ;;  %v2137_v9 = vmul.f32 %v4540_v4, %v5418_v8  ;;  %v1352_v12 = vpop.f32.mrb[43].mxu0  ;;  %v1608_v13 = vpop.f32.mrb[43].mxu1 }
 0x1da   : > { %4396 = vst [vmem:[%s5443_s26 + $0x198] sm:$0xff] %v4284_v59   ;;  %v2335_v7 = vadd.f32 %v5420_v10, %v2200_v61  ;;  %v2201_v11 = vmul.f32 %v4604_v5, %v5418_v8  ;;  %v2269_v14 = vadd.f32 %v5420_v10, %v2134_v2  ;;  %v2333_v15 = vadd.f32 %v5420_v10, %v2198_v3 }
 0x1db   : > { %4363 = vst [vmem:[%s5443_s26 + $0x90] sm:$0xff] %v4119_v0   ;;  %4395 = vst [vmem:[%s5443_s26 + $0x190] sm:$0xff] %v4279_v1   ;;  %v2135_v16 = vmul.f32 %v5418_v8, %v1352_v12  ;;  %v2199_v17 = vmul.f32 %v5418_v8, %v1608_v13  ;;  %v2272_v18 = vadd.f32 %v5420_v10, %v2137_v9  ;;  %v2399_v22 = vmax.f32 %v2271_v6, 0.0 }
 0x1dc   : > { %v2336_v19 = vadd.f32 %v5420_v10, %v2201_v11  ;;  %v2463_v23 = vmax.f32 %v2335_v7, 0.0  ;;  %v2397_v26 = vmax.f32 %v2269_v14, 0.0  ;;  %v2461_v27 = vmax.f32 %v2333_v15, 0.0 }
 0x1dd   : > { %v2270_v20 = vadd.f32 %v5420_v10, %v2135_v16  ;;  %v2334_v21 = vadd.f32 %v5420_v10, %v2199_v17  ;;  %v2400_v24 = vmax.f32 %v2272_v18, 0.0 }
 0x1de   : > { %v2464_v25 = vmax.f32 %v2336_v19, 0.0  ;;  %v4543_v30 = vpop.f32.mrb[44].mxu0  ;;  %v4607_v31 = vpop.f32.mrb[44].mxu1 }
 0x1df   : > { %v2398_v28 = vmax.f32 %v2270_v20, 0.0  ;;  %v2462_v29 = vmax.f32 %v2334_v21, 0.0  ;;  %v4134_v32 = vpack.c.bf16 %v2400_v24, %v2399_v22  ;;  %v2140_v34 = vmul.f32 %v4543_v30, %v5418_v8  ;;  %v1365_v36 = vpop.f32.mrb[45].mxu0  ;;  %v1621_v37 = vpop.f32.mrb[45].mxu1 }
 0x1e0   : > { %v4294_v33 = vpack.c.bf16 %v2464_v25, %v2463_v23  ;;  %v2204_v35 = vmul.f32 %v4607_v31, %v5418_v8  ;;  %v2138_v40 = vmul.f32 %v5418_v8, %v1365_v36  ;;  %v2202_v41 = vmul.f32 %v5418_v8, %v1621_v37  ;;  %v4544_v42 = vpop.f32.mrb[46].mxu0  ;;  %v4608_v43 = vpop.f32.mrb[46].mxu1 }
 0x1e1   : > { %v4129_v38 = vpack.c.bf16 %v2398_v28, %v2397_v26  ;;  %v4289_v39 = vpack.c.bf16 %v2462_v29, %v2461_v27  ;;  %4366 = vst [vmem:[%s5443_s26 + $0xa8] sm:$0xff] %v4134_v32   ;;  %v2275_v44 = vadd.f32 %v5420_v10, %v2140_v34  ;;  %v2141_v46 = vmul.f32 %v4544_v42, %v5418_v8  ;;  %v1368_v48 = vpop.f32.mrb[47].mxu0  ;;  %v1624_v49 = vpop.f32.mrb[47].mxu1 }
 0x1e2   : > { %4398 = vst [vmem:[%s5443_s26 + $0x1a8] sm:$0xff] %v4294_v33   ;;  %v2339_v45 = vadd.f32 %v5420_v10, %v2204_v35  ;;  %v2205_v47 = vmul.f32 %v4608_v43, %v5418_v8  ;;  %v2273_v50 = vadd.f32 %v5420_v10, %v2138_v40  ;;  %v2337_v51 = vadd.f32 %v5420_v10, %v2202_v41  ;;  %v5681_v43 = vld [vmem:[#allocation7] ss:$0 sm:$0xff] }
 0x1e3   : > { %4365 = vst [vmem:[%s5443_s26 + $0xa0] sm:$0xff] %v4129_v38   ;;  %4397 = vst [vmem:[%s5443_s26 + $0x1a0] sm:$0xff] %v4289_v39   ;;  %v2139_v52 = vmul.f32 %v5418_v8, %v1368_v48  ;;  %v2203_v53 = vmul.f32 %v5418_v8, %v1624_v49  ;;  %v2276_v54 = vadd.f32 %v5420_v10, %v2141_v46  ;;  %v2403_v58 = vmax.f32 %v2275_v44, 0.0 }
 0x1e4   : > { %v2340_v55 = vadd.f32 %v5420_v10, %v2205_v47  ;;  %v2467_v59 = vmax.f32 %v2339_v45, 0.0  ;;  %v2401_v62 = vmax.f32 %v2273_v50, 0.0  ;;  %v2465_v63 = vmax.f32 %v2337_v51, 0.0 }
 0x1e5   : > { %v2274_v56 = vadd.f32 %v5420_v10, %v2139_v52  ;;  %v2338_v57 = vadd.f32 %v5420_v10, %v2203_v53  ;;  %v2404_v60 = vmax.f32 %v2276_v54, 0.0  ;;  %v5689_v53 = vld [vmem:[#allocation8] ss:$0 sm:$0xff] }
 0x1e6   : > { %v2468_v61 = vmax.f32 %v2340_v55, 0.0  ;;  %v4547_v2 = vpop.f32.mrb[48].mxu0  ;;  %v4611_v3 = vpop.f32.mrb[48].mxu1 }
 0x1e7   : > { %v2402_v0 = vmax.f32 %v2274_v56, 0.0  ;;  %v2466_v1 = vmax.f32 %v2338_v57, 0.0  ;;  %v4144_v4 = vpack.c.bf16 %v2404_v60, %v2403_v58  ;;  %v2144_v6 = vmul.f32 %v4547_v2, %v5418_v8  ;;  %v1381_v9 = vpop.f32.mrb[49].mxu0  ;;  %v1637_v11 = vpop.f32.mrb[49].mxu1 }
 0x1e8   : > { %v4304_v5 = vpack.c.bf16 %v2468_v61, %v2467_v59  ;;  %v2208_v7 = vmul.f32 %v4611_v3, %v5418_v8  ;;  %v2142_v14 = vmul.f32 %v5418_v8, %v1381_v9  ;;  %v2206_v15 = vmul.f32 %v5418_v8, %v1637_v11  ;;  %v4548_v16 = vpop.f32.mrb[50].mxu0  ;;  %v4612_v17 = vpop.f32.mrb[50].mxu1 }
 0x1e9   : > { %v4139_v12 = vpack.c.bf16 %v2402_v0, %v2401_v62  ;;  %v4299_v13 = vpack.c.bf16 %v2466_v1, %v2465_v63  ;;  %4368 = vst [vmem:[%s5443_s26 + $0xb8] sm:$0xff] %v4144_v4   ;;  %v2279_v18 = vadd.f32 %v5420_v10, %v2144_v6  ;;  %v2145_v20 = vmul.f32 %v4548_v16, %v5418_v8  ;;  %v1384_v22 = vpop.f32.mrb[51].mxu0  ;;  %v1640_v23 = vpop.f32.mrb[51].mxu1 }
 0x1ea   : > { %4400 = vst [vmem:[%s5443_s26 + $0x1b8] sm:$0xff] %v4304_v5   ;;  %v2343_v19 = vadd.f32 %v5420_v10, %v2208_v7  ;;  %v2209_v21 = vmul.f32 %v4612_v17, %v5418_v8  ;;  %v2277_v24 = vadd.f32 %v5420_v10, %v2142_v14  ;;  %v2341_v25 = vadd.f32 %v5420_v10, %v2206_v15 }
 0x1eb   : > { %4367 = vst [vmem:[%s5443_s26 + $0xb0] sm:$0xff] %v4139_v12   ;;  %4399 = vst [vmem:[%s5443_s26 + $0x1b0] sm:$0xff] %v4299_v13   ;;  %v2143_v26 = vmul.f32 %v5418_v8, %v1384_v22  ;;  %v2207_v27 = vmul.f32 %v5418_v8, %v1640_v23  ;;  %v2280_v28 = vadd.f32 %v5420_v10, %v2145_v20  ;;  %v2407_v32 = vmax.f32 %v2279_v18, 0.0 }
 0x1ec   : > { %v2344_v29 = vadd.f32 %v5420_v10, %v2209_v21  ;;  %v2471_v33 = vmax.f32 %v2343_v19, 0.0  ;;  %v2405_v36 = vmax.f32 %v2277_v24, 0.0  ;;  %v2469_v37 = vmax.f32 %v2341_v25, 0.0 }
 0x1ed   : > { %v2278_v30 = vadd.f32 %v5420_v10, %v2143_v26  ;;  %v2342_v31 = vadd.f32 %v5420_v10, %v2207_v27  ;;  %v2408_v34 = vmax.f32 %v2280_v28, 0.0 }
 0x1ee   : > { %v2472_v35 = vmax.f32 %v2344_v29, 0.0  ;;  %v4551_v40 = vpop.f32.mrb[52].mxu0  ;;  %v4615_v8 = vpop.f32.mrb[52].mxu1 }
 0x1ef   : > { %v2406_v38 = vmax.f32 %v2278_v30, 0.0  ;;  %v2470_v39 = vmax.f32 %v2342_v31, 0.0  ;;  %v4154_v41 = vpack.c.bf16 %v2408_v34, %v2407_v32  ;;  %v2148_v44 = vmul.f32 %v5681_v43, %v4551_v40  ;;  %v1397_v45 = vpop.f32.mrb[53].mxu0  ;;  %v1653_v46 = vpop.f32.mrb[53].mxu1 }
 0x1f0   : > { %v4314_v42 = vpack.c.bf16 %v2472_v35, %v2471_v33  ;;  %v2212_v10 = vmul.f32 %v5681_v43, %v4615_v8  ;;  %v2146_v49 = vmul.f32 %v5681_v43, %v1397_v45  ;;  %v2210_v50 = vmul.f32 %v5681_v43, %v1653_v46  ;;  %v4552_v51 = vpop.f32.mrb[54].mxu0  ;;  %v4616_v52 = vpop.f32.mrb[54].mxu1 }
 0x1f1   : > { %v4149_v47 = vpack.c.bf16 %v2406_v38, %v2405_v36  ;;  %v4309_v48 = vpack.c.bf16 %v2470_v39, %v2469_v37  ;;  %4370 = vst [vmem:[%s5443_s26 + $0xc8] sm:$0xff] %v4154_v41   ;;  %v2283_v54 = vadd.f32 %v5689_v53, %v2148_v44  ;;  %v2149_v56 = vmul.f32 %v5681_v43, %v4552_v51  ;;  %v1400_v58 = vpop.f32.mrb[55].mxu0  ;;  %v1656_v59 = vpop.f32.mrb[55].mxu1 }
 0x1f2   : > { %4402 = vst [vmem:[%s5443_s26 + $0x1c8] sm:$0xff] %v4314_v42   ;;  %v2347_v55 = vadd.f32 %v5689_v53, %v2212_v10  ;;  %v2213_v57 = vmul.f32 %v5681_v43, %v4616_v52  ;;  %v2281_v60 = vadd.f32 %v5689_v53, %v2146_v49  ;;  %v2345_v61 = vadd.f32 %v5689_v53, %v2210_v50 }
 0x1f3   : > { %4369 = vst [vmem:[%s5443_s26 + $0xc0] sm:$0xff] %v4149_v47   ;;  %4401 = vst [vmem:[%s5443_s26 + $0x1c0] sm:$0xff] %v4309_v48   ;;  %v2147_v62 = vmul.f32 %v5681_v43, %v1400_v58  ;;  %v2211_v63 = vmul.f32 %v5681_v43, %v1656_v59  ;;  %v2284_v0 = vadd.f32 %v5689_v53, %v2149_v56  ;;  %v2411_v4 = vmax.f32 %v2283_v54, 0.0 }
 0x1f4   : > { %v2348_v1 = vadd.f32 %v5689_v53, %v2213_v57  ;;  %v2475_v5 = vmax.f32 %v2347_v55, 0.0  ;;  %v2409_v9 = vmax.f32 %v2281_v60, 0.0  ;;  %v2473_v11 = vmax.f32 %v2345_v61, 0.0 }
 0x1f5   : > { %v2282_v2 = vadd.f32 %v5689_v53, %v2147_v62  ;;  %v2346_v3 = vadd.f32 %v5689_v53, %v2211_v63  ;;  %v2412_v6 = vmax.f32 %v2284_v0, 0.0 }
 0x1f6   : > { %v2476_v7 = vmax.f32 %v2348_v1, 0.0  ;;  %v4555_v14 = vpop.f32.mrb[56].mxu0  ;;  %v4619_v15 = vpop.f32.mrb[56].mxu1 }
 0x1f7   : > { %v2410_v12 = vmax.f32 %v2282_v2, 0.0  ;;  %v2474_v13 = vmax.f32 %v2346_v3, 0.0  ;;  %v4164_v16 = vpack.c.bf16 %v2412_v6, %v2411_v4  ;;  %v2152_v18 = vmul.f32 %v5681_v43, %v4555_v14  ;;  %v1413_v20 = vpop.f32.mrb[57].mxu0  ;;  %v1669_v21 = vpop.f32.mrb[57].mxu1 }
 0x1f8   : > { %v4324_v17 = vpack.c.bf16 %v2476_v7, %v2475_v5  ;;  %v2216_v19 = vmul.f32 %v5681_v43, %v4619_v15  ;;  %v2150_v24 = vmul.f32 %v5681_v43, %v1413_v20  ;;  %v2214_v25 = vmul.f32 %v5681_v43, %v1669_v21  ;;  %v4556_v26 = vpop.f32.mrb[58].mxu0  ;;  %v4620_v27 = vpop.f32.mrb[58].mxu1 }
 0x1f9   : > { %v4159_v22 = vpack.c.bf16 %v2410_v12, %v2409_v9  ;;  %v4319_v23 = vpack.c.bf16 %v2474_v13, %v2473_v11  ;;  %4372 = vst [vmem:[%s5443_s26 + $0xd8] sm:$0xff] %v4164_v16   ;;  %v2287_v28 = vadd.f32 %v5689_v53, %v2152_v18  ;;  %v2153_v30 = vmul.f32 %v5681_v43, %v4556_v26  ;;  %v1416_v32 = vpop.f32.mrb[59].mxu0  ;;  %v1672_v33 = vpop.f32.mrb[59].mxu1 }
 0x1fa   : > { %4404 = vst [vmem:[%s5443_s26 + $0x1d8] sm:$0xff] %v4324_v17   ;;  %v2351_v29 = vadd.f32 %v5689_v53, %v2216_v19  ;;  %v2217_v31 = vmul.f32 %v5681_v43, %v4620_v27  ;;  %v2285_v34 = vadd.f32 %v5689_v53, %v2150_v24  ;;  %v2349_v35 = vadd.f32 %v5689_v53, %v2214_v25 }
 0x1fb   : > { %4371 = vst [vmem:[%s5443_s26 + $0xd0] sm:$0xff] %v4159_v22   ;;  %4403 = vst [vmem:[%s5443_s26 + $0x1d0] sm:$0xff] %v4319_v23   ;;  %v2151_v36 = vmul.f32 %v5681_v43, %v1416_v32  ;;  %v2215_v37 = vmul.f32 %v5681_v43, %v1672_v33  ;;  %v2288_v38 = vadd.f32 %v5689_v53, %v2153_v30  ;;  %v2415_v41 = vmax.f32 %v2287_v28, 0.0 }
 0x1fc   : > { %v2352_v39 = vadd.f32 %v5689_v53, %v2217_v31  ;;  %v2479_v42 = vmax.f32 %v2351_v29, 0.0  ;;  %v2413_v45 = vmax.f32 %v2285_v34, 0.0  ;;  %v2477_v46 = vmax.f32 %v2349_v35, 0.0 }
 0x1fd   : > { %v2286_v40 = vadd.f32 %v5689_v53, %v2151_v36  ;;  %v2350_v8 = vadd.f32 %v5689_v53, %v2215_v37  ;;  %v2416_v44 = vmax.f32 %v2288_v38, 0.0 }
 0x1fe   : > { %v2480_v10 = vmax.f32 %v2352_v39, 0.0  ;;  %v4559_v49 = vpop.f32.mrb[60].mxu0  ;;  %v4623_v50 = vpop.f32.mrb[60].mxu1 }
 0x1ff   : > { %v2414_v47 = vmax.f32 %v2286_v40, 0.0  ;;  %v2478_v48 = vmax.f32 %v2350_v8, 0.0  ;;  %v4174_v51 = vpack.c.bf16 %v2416_v44, %v2415_v41  ;;  %v2156_v54 = vmul.f32 %v5681_v43, %v4559_v49  ;;  %v1429_v56 = vpop.f32.mrb[61].mxu0  ;;  %v1685_v57 = vpop.f32.mrb[61].mxu1 }
 0x200   : > { %v4334_v52 = vpack.c.bf16 %v2480_v10, %v2479_v42  ;;  %v2220_v55 = vmul.f32 %v5681_v43, %v4623_v50  ;;  %v2154_v60 = vmul.f32 %v5681_v43, %v1429_v56  ;;  %v2218_v61 = vmul.f32 %v5681_v43, %v1685_v57  ;;  %v4560_v62 = vpop.f32.mrb[62].mxu0  ;;  %v4624_v63 = vpop.f32.mrb[62].mxu1 }
 0x201   : > { %v4169_v58 = vpack.c.bf16 %v2414_v47, %v2413_v45  ;;  %v4329_v59 = vpack.c.bf16 %v2478_v48, %v2477_v46  ;;  %4374 = vst [vmem:[%s5443_s26 + $0xe8] sm:$0xff] %v4174_v51   ;;  %v2291_v0 = vadd.f32 %v5689_v53, %v2156_v54  ;;  %v2157_v2 = vmul.f32 %v5681_v43, %v4560_v62  ;;  %v1432_v4 = vpop.f32.mrb[63].mxu0  ;;  %v1688_v5 = vpop.f32.mrb[63].mxu1 }
 0x202   : > { %4406 = vst [vmem:[%s5443_s26 + $0x1e8] sm:$0xff] %v4334_v52   ;;  %v2355_v1 = vadd.f32 %v5689_v53, %v2220_v55  ;;  %v2221_v3 = vmul.f32 %v5681_v43, %v4624_v63  ;;  %v2289_v6 = vadd.f32 %v5689_v53, %v2154_v60  ;;  %v2353_v7 = vadd.f32 %v5689_v53, %v2218_v61 }
 0x203   : > { %4373 = vst [vmem:[%s5443_s26 + $0xe0] sm:$0xff] %v4169_v58   ;;  %4405 = vst [vmem:[%s5443_s26 + $0x1e0] sm:$0xff] %v4329_v59   ;;  %v2155_v9 = vmul.f32 %v5681_v43, %v1432_v4  ;;  %v2219_v11 = vmul.f32 %v5681_v43, %v1688_v5  ;;  %v2292_v12 = vadd.f32 %v5689_v53, %v2157_v2  ;;  %v2419_v16 = vmax.f32 %v2291_v0, 0.0 }
 0x204   : > { %v2356_v13 = vadd.f32 %v5689_v53, %v2221_v3  ;;  %v2483_v17 = vmax.f32 %v2355_v1, 0.0  ;;  %v2417_v20 = vmax.f32 %v2289_v6, 0.0  ;;  %v2481_v21 = vmax.f32 %v2353_v7, 0.0 }
 0x205   : > { %v2290_v14 = vadd.f32 %v5689_v53, %v2155_v9  ;;  %v2354_v15 = vadd.f32 %v5689_v53, %v2219_v11  ;;  %v2420_v18 = vmax.f32 %v2292_v12, 0.0  ;;  %3131 = sbr.rel (!%p5976_p12) target bundleno = 615 (0x267), region = 64 }
 0x206   : > { %v2484_v19 = vmax.f32 %v2356_v13, 0.0 }
 0x207   : > { %v2418_v22 = vmax.f32 %v2290_v14, 0.0  ;;  %v2482_v43 = vmax.f32 %v2354_v15, 0.0  ;;  %v4184_v23 = vpack.c.bf16 %v2420_v18, %v2419_v16 }
 0x208   : > { %v4344_v24 = vpack.c.bf16 %v2484_v19, %v2483_v17 }
 0x209   : > { %v4179_v25 = vpack.c.bf16 %v2418_v22, %v2417_v20  ;;  %v4339_v26 = vpack.c.bf16 %v2482_v43, %v2481_v21  ;;  %4376 = vst [vmem:[%s5443_s26 + $0xf8] sm:$0xff] %v4184_v23  }
 0x20a   : > { %4408 = vst [vmem:[%s5443_s26 + $0x1f8] sm:$0xff] %v4344_v24  }
 0x20b   : > { %4375 = vst [vmem:[%s5443_s26 + $0xf0] sm:$0xff] %v4179_v25   ;;  %4407 = vst [vmem:[%s5443_s26 + $0x1f0] sm:$0xff] %v4339_v26  }
 0x20c   : > { %s5992_s7 = smov (!%p3134_p4, %s3133_s7), 128 }
 0x20d   : > { %s3879_s22 = sshll.u32 %s5992_s7, 6 }
 0x20e   : > { %p3882_p5 = scmp.eq.s32.totalorder %s3879_s22, 0 }
 0x20f   : > { %s5762_s29 = sshrl.u32 (!%p3882_p5), %s5992_s7, 6 }
 0x210   : > { %3143 = sbr.rel (%p3882_p5) target bundleno = 615 (0x267), region = 68  ;;  %p3883_p8 = scmp.le.s32.totalorder (!%p3882_p5), %s5762_s29, 0 }
 0x217   : > { %3570 = sbr.rel (%p3883_p8) target bundleno = 594 (0x252), region = 149  ;;  %s5977_s18 = smov (!%p3883_p8), %s5756_s5 }
 0x218   : > { %s5978_s23 = smov (!%p3883_p8), %s5443_s26  ;;  %s5771_s28 = smov (!%p3883_p8), 0  }
 0x219   : > { %s5773_s10 = smov (!%p3883_p8), 0  }
 0x21e LB: >> { %v3159_v53 = vld [vmem:[%s5073_s23] sm:$0xf]  ;;  %v3161_v27 = vld [vmem:[%s5073_s23 + $0x4] sm:$0xf]  ;;  %v3163_v28 = vld [vmem:[%s5073_s23 + $0x8] sm:$0xf]  ;;  %s5081_s10 = sphi %s5773_s10, %s3153_s10   ;;  %s5077_s28 = sphi %s5771_s28, %s5979_s28   ;;  %s5073_s23 = sphi %s5978_s23, %s3292_s23   ;;  %s5069_s18 = sphi %s5977_s18, %s3293_s18  }
 0x21f   : >> { %3160 = vst [vmem:[%s5069_s18] sm:$0xf] %v3159_v53  ;;  %3162 = vst [vmem:[%s5069_s18 + $0x4] sm:$0xf] %v3161_v27  ;;  %v3165_v29 = vld [vmem:[%s5073_s23 + $0xc] sm:$0xf]  ;;  %s3287_s12 = sadd.s32 1, %s5077_s28 }
 0x220   : >> { %3164 = vst [vmem:[%s5069_s18 + $0x8] sm:$0xf] %v3163_v28  ;;  %v3167_v30 = vld [vmem:[%s5073_s23 + $0x10] sm:$0xf]  ;;  %v3169_v31 = vld [vmem:[%s5073_s23 + $0x14] sm:$0xf]  ;;  %p3288_p10 = scmp.ge.s32.totalorder %s3287_s12, %s5762_s29 }
 0x221   : >> { %3166 = vst [vmem:[%s5069_s18 + $0xc] sm:$0xf] %v3165_v29  ;;  %3168 = vst [vmem:[%s5069_s18 + $0x10] sm:$0xf] %v3167_v30  ;;  %v3171_v32 = vld [vmem:[%s5073_s23 + $0x18] sm:$0xf] }
 0x222   : >> { %3170 = vst [vmem:[%s5069_s18 + $0x14] sm:$0xf] %v3169_v31  ;;  %v3173_v33 = vld [vmem:[%s5073_s23 + $0x1c] sm:$0xf]  ;;  %v3175_v34 = vld [vmem:[%s5073_s23 + $0x20] sm:$0xf] }
 0x223   : >> { %3172 = vst [vmem:[%s5069_s18 + $0x18] sm:$0xf] %v3171_v32  ;;  %3174 = vst [vmem:[%s5069_s18 + $0x1c] sm:$0xf] %v3173_v33  ;;  %v3177_v35 = vld [vmem:[%s5073_s23 + $0x24] sm:$0xf] }
 0x224   : >> { %3176 = vst [vmem:[%s5069_s18 + $0x20] sm:$0xf] %v3175_v34  ;;  %v3179_v36 = vld [vmem:[%s5073_s23 + $0x28] sm:$0xf]  ;;  %v3181_v37 = vld [vmem:[%s5073_s23 + $0x2c] sm:$0xf] }
 0x225   : >> { %3178 = vst [vmem:[%s5069_s18 + $0x24] sm:$0xf] %v3177_v35  ;;  %3180 = vst [vmem:[%s5069_s18 + $0x28] sm:$0xf] %v3179_v36  ;;  %v3183_v38 = vld [vmem:[%s5073_s23 + $0x30] sm:$0xf] }
 0x226   : >> { %3182 = vst [vmem:[%s5069_s18 + $0x2c] sm:$0xf] %v3181_v37  ;;  %v3185_v39 = vld [vmem:[%s5073_s23 + $0x34] sm:$0xf]  ;;  %v3187_v40 = vld [vmem:[%s5073_s23 + $0x38] sm:$0xf] }
 0x227   : >> { %3184 = vst [vmem:[%s5069_s18 + $0x30] sm:$0xf] %v3183_v38  ;;  %3186 = vst [vmem:[%s5069_s18 + $0x34] sm:$0xf] %v3185_v39  ;;  %v3189_v8 = vld [vmem:[%s5073_s23 + $0x3c] sm:$0xf] }
 0x228   : >> { %3188 = vst [vmem:[%s5069_s18 + $0x38] sm:$0xf] %v3187_v40  ;;  %v3191_v41 = vld [vmem:[%s5073_s23 + $0x40] sm:$0xf]  ;;  %v3193_v42 = vld [vmem:[%s5073_s23 + $0x44] sm:$0xf] }
 0x229   : >> { %3190 = vst [vmem:[%s5069_s18 + $0x3c] sm:$0xf] %v3189_v8  ;;  %3192 = vst [vmem:[%s5069_s18 + $0x40] sm:$0xf] %v3191_v41  ;;  %v3195_v44 = vld [vmem:[%s5073_s23 + $0x48] sm:$0xf] }
 0x22a   : >> { %3194 = vst [vmem:[%s5069_s18 + $0x44] sm:$0xf] %v3193_v42  ;;  %v3197_v10 = vld [vmem:[%s5073_s23 + $0x4c] sm:$0xf]  ;;  %v3199_v45 = vld [vmem:[%s5073_s23 + $0x50] sm:$0xf] }
 0x22b   : >> { %3196 = vst [vmem:[%s5069_s18 + $0x48] sm:$0xf] %v3195_v44  ;;  %3198 = vst [vmem:[%s5069_s18 + $0x4c] sm:$0xf] %v3197_v10  ;;  %v3201_v46 = vld [vmem:[%s5073_s23 + $0x54] sm:$0xf] }
 0x22c   : >> { %3200 = vst [vmem:[%s5069_s18 + $0x50] sm:$0xf] %v3199_v45  ;;  %v3203_v47 = vld [vmem:[%s5073_s23 + $0x58] sm:$0xf]  ;;  %v3205_v48 = vld [vmem:[%s5073_s23 + $0x5c] sm:$0xf] }
 0x22d   : >> { %3202 = vst [vmem:[%s5069_s18 + $0x54] sm:$0xf] %v3201_v46  ;;  %3204 = vst [vmem:[%s5069_s18 + $0x58] sm:$0xf] %v3203_v47  ;;  %v3207_v49 = vld [vmem:[%s5073_s23 + $0x60] sm:$0xf] }
 0x22e   : >> { %3206 = vst [vmem:[%s5069_s18 + $0x5c] sm:$0xf] %v3205_v48  ;;  %v3209_v50 = vld [vmem:[%s5073_s23 + $0x64] sm:$0xf]  ;;  %v3211_v51 = vld [vmem:[%s5073_s23 + $0x68] sm:$0xf] }
 0x22f   : >> { %3208 = vst [vmem:[%s5069_s18 + $0x60] sm:$0xf] %v3207_v49  ;;  %3210 = vst [vmem:[%s5069_s18 + $0x64] sm:$0xf] %v3209_v50  ;;  %v3213_v52 = vld [vmem:[%s5073_s23 + $0x6c] sm:$0xf] }
 0x230   : >> { %3212 = vst [vmem:[%s5069_s18 + $0x68] sm:$0xf] %v3211_v51  ;;  %v3215_v54 = vld [vmem:[%s5073_s23 + $0x70] sm:$0xf]  ;;  %v3217_v55 = vld [vmem:[%s5073_s23 + $0x74] sm:$0xf] }
 0x231   : >> { %3214 = vst [vmem:[%s5069_s18 + $0x6c] sm:$0xf] %v3213_v52  ;;  %3216 = vst [vmem:[%s5069_s18 + $0x70] sm:$0xf] %v3215_v54  ;;  %v3219_v56 = vld [vmem:[%s5073_s23 + $0x78] sm:$0xf] }
 0x232   : >> { %3218 = vst [vmem:[%s5069_s18 + $0x74] sm:$0xf] %v3217_v55  ;;  %v3221_v57 = vld [vmem:[%s5073_s23 + $0x7c] sm:$0xf]  ;;  %v3223_v58 = vld [vmem:[%s5073_s23 + $0x80] sm:$0xf] }
 0x233   : >> { %3220 = vst [vmem:[%s5069_s18 + $0x78] sm:$0xf] %v3219_v56  ;;  %3222 = vst [vmem:[%s5069_s18 + $0x7c] sm:$0xf] %v3221_v57  ;;  %v3225_v59 = vld [vmem:[%s5073_s23 + $0x84] sm:$0xf] }
 0x234   : >> { %3224 = vst [vmem:[%s5069_s18 + $0x80] sm:$0xf] %v3223_v58  ;;  %v3227_v60 = vld [vmem:[%s5073_s23 + $0x88] sm:$0xf]  ;;  %v3229_v61 = vld [vmem:[%s5073_s23 + $0x8c] sm:$0xf] }
 0x235   : >> { %3226 = vst [vmem:[%s5069_s18 + $0x84] sm:$0xf] %v3225_v59  ;;  %3228 = vst [vmem:[%s5069_s18 + $0x88] sm:$0xf] %v3227_v60  ;;  %v3231_v62 = vld [vmem:[%s5073_s23 + $0x90] sm:$0xf] }
 0x236   : >> { %3230 = vst [vmem:[%s5069_s18 + $0x8c] sm:$0xf] %v3229_v61  ;;  %v3233_v63 = vld [vmem:[%s5073_s23 + $0x94] sm:$0xf]  ;;  %v3235_v0 = vld [vmem:[%s5073_s23 + $0x98] sm:$0xf] }
 0x237   : >> { %3232 = vst [vmem:[%s5069_s18 + $0x90] sm:$0xf] %v3231_v62  ;;  %3234 = vst [vmem:[%s5069_s18 + $0x94] sm:$0xf] %v3233_v63  ;;  %v3237_v1 = vld [vmem:[%s5073_s23 + $0x9c] sm:$0xf] }
 0x238   : >> { %3236 = vst [vmem:[%s5069_s18 + $0x98] sm:$0xf] %v3235_v0  ;;  %v3239_v2 = vld [vmem:[%s5073_s23 + $0xa0] sm:$0xf]  ;;  %v3241_v3 = vld [vmem:[%s5073_s23 + $0xa4] sm:$0xf] }
 0x239   : >> { %3238 = vst [vmem:[%s5069_s18 + $0x9c] sm:$0xf] %v3237_v1  ;;  %3240 = vst [vmem:[%s5069_s18 + $0xa0] sm:$0xf] %v3239_v2  ;;  %v3243_v4 = vld [vmem:[%s5073_s23 + $0xa8] sm:$0xf] }
 0x23a   : >> { %3242 = vst [vmem:[%s5069_s18 + $0xa4] sm:$0xf] %v3241_v3  ;;  %v3245_v5 = vld [vmem:[%s5073_s23 + $0xac] sm:$0xf]  ;;  %v3247_v6 = vld [vmem:[%s5073_s23 + $0xb0] sm:$0xf] }
 0x23b   : >> { %3244 = vst [vmem:[%s5069_s18 + $0xa8] sm:$0xf] %v3243_v4  ;;  %3246 = vst [vmem:[%s5069_s18 + $0xac] sm:$0xf] %v3245_v5  ;;  %v3249_v7 = vld [vmem:[%s5073_s23 + $0xb4] sm:$0xf] }
 0x23c   : >> { %3248 = vst [vmem:[%s5069_s18 + $0xb0] sm:$0xf] %v3247_v6  ;;  %v3251_v9 = vld [vmem:[%s5073_s23 + $0xb8] sm:$0xf]  ;;  %v3253_v11 = vld [vmem:[%s5073_s23 + $0xbc] sm:$0xf] }
 0x23d   : >> { %3250 = vst [vmem:[%s5069_s18 + $0xb4] sm:$0xf] %v3249_v7  ;;  %3252 = vst [vmem:[%s5069_s18 + $0xb8] sm:$0xf] %v3251_v9  ;;  %v3255_v12 = vld [vmem:[%s5073_s23 + $0xc0] sm:$0xf] }
 0x23e   : >> { %3254 = vst [vmem:[%s5069_s18 + $0xbc] sm:$0xf] %v3253_v11  ;;  %v3257_v13 = vld [vmem:[%s5073_s23 + $0xc4] sm:$0xf]  ;;  %v3259_v14 = vld [vmem:[%s5073_s23 + $0xc8] sm:$0xf] }
 0x23f   : >> { %3256 = vst [vmem:[%s5069_s18 + $0xc0] sm:$0xf] %v3255_v12  ;;  %3258 = vst [vmem:[%s5069_s18 + $0xc4] sm:$0xf] %v3257_v13  ;;  %v3261_v15 = vld [vmem:[%s5073_s23 + $0xcc] sm:$0xf] }
 0x240   : >> { %3260 = vst [vmem:[%s5069_s18 + $0xc8] sm:$0xf] %v3259_v14  ;;  %v3263_v16 = vld [vmem:[%s5073_s23 + $0xd0] sm:$0xf]  ;;  %v3265_v17 = vld [vmem:[%s5073_s23 + $0xd4] sm:$0xf] }
 0x241   : >> { %3262 = vst [vmem:[%s5069_s18 + $0xcc] sm:$0xf] %v3261_v15  ;;  %3264 = vst [vmem:[%s5069_s18 + $0xd0] sm:$0xf] %v3263_v16  ;;  %v3267_v18 = vld [vmem:[%s5073_s23 + $0xd8] sm:$0xf] }
 0x242   : >> { %3266 = vst [vmem:[%s5069_s18 + $0xd4] sm:$0xf] %v3265_v17  ;;  %v3269_v19 = vld [vmem:[%s5073_s23 + $0xdc] sm:$0xf]  ;;  %v3271_v20 = vld [vmem:[%s5073_s23 + $0xe0] sm:$0xf] }
 0x243   : >> { %3268 = vst [vmem:[%s5069_s18 + $0xd8] sm:$0xf] %v3267_v18  ;;  %3270 = vst [vmem:[%s5069_s18 + $0xdc] sm:$0xf] %v3269_v19  ;;  %v3273_v21 = vld [vmem:[%s5073_s23 + $0xe4] sm:$0xf] }
 0x244   : >> { %3272 = vst [vmem:[%s5069_s18 + $0xe0] sm:$0xf] %v3271_v20  ;;  %v3275_v22 = vld [vmem:[%s5073_s23 + $0xe8] sm:$0xf]  ;;  %v3277_v43 = vld [vmem:[%s5073_s23 + $0xec] sm:$0xf] }
 0x245   : >> { %3274 = vst [vmem:[%s5069_s18 + $0xe4] sm:$0xf] %v3273_v21  ;;  %3276 = vst [vmem:[%s5069_s18 + $0xe8] sm:$0xf] %v3275_v22  ;;  %v3279_v23 = vld [vmem:[%s5073_s23 + $0xf0] sm:$0xf] }
 0x246   : >> { %3278 = vst [vmem:[%s5069_s18 + $0xec] sm:$0xf] %v3277_v43  ;;  %v3281_v24 = vld [vmem:[%s5073_s23 + $0xf4] sm:$0xf]  ;;  %v3283_v25 = vld [vmem:[%s5073_s23 + $0xf8] sm:$0xf] }
 0x247   : >> { %3280 = vst [vmem:[%s5069_s18 + $0xf0] sm:$0xf] %v3279_v23  ;;  %3282 = vst [vmem:[%s5069_s18 + $0xf4] sm:$0xf] %v3281_v24  ;;  %v3285_v26 = vld [vmem:[%s5073_s23 + $0xfc] sm:$0xf] }
 0x248   : >> { %3284 = vst [vmem:[%s5069_s18 + $0xf8] sm:$0xf] %v3283_v25  ;;  %3286 = vst [vmem:[%s5069_s18 + $0xfc] sm:$0xf] %v3285_v26  ;;  %s5994_s12 = smov (%p3288_p10, %s3287_s12), 0  ;;  %s3153_s10 = sadd.s32 1, %s5081_s10  }
 0x249   : >> { %s3884_s13 = sshll.u32 %s5994_s12, 8  ;;  %p3152_p6 = scmp.ge.s32.totalorder %s3153_s10, %s5762_s29 }
 0x24a   : >> { %s3292_s23 = scalar_lea.vmem %s5443_s26, %s3884_s13 [#allocation10]   ;;  %s3293_s18 = scalar_lea.vmem %s5756_s5, %s3884_s13  }
 0x24b   : >> { %s5979_s28 = smov %s5994_s12  ;;  %3155 = sbr.rel (!%p3152_p6) target bundleno = 542 (0x21e), region = 155 }
 0x252 PF: > { %s5930_s11 = sand.u32 63, %s5992_s7   ;;  %s4024_s24 = sshll.u32 %s5762_s29, 8 }
 0x253   : > { %s3298_s15 = scalar_lea.vmem %s5443_s26, %s4024_s24 [#allocation10]   ;;  %s3300_s21 = scalar_lea.vmem %s5756_s5, %s4024_s24  }
 0x254   : > { %p3889_p7 = scmp.le.s32.totalorder %s5930_s11, 0 }
 0x255   : > { %s5083_s9 = smov (!%p3889_p7), %s3300_s21   ;;  %s5087_s8 = smov (!%p3889_p7), %s3298_s15  }
 0x256   : > { %3584 = sbr.rel (%p3889_p7) target bundleno = 615 (0x267), region = 160  ;;  %s5091_s6 = smov (!%p3889_p7), 0  }
 0x257   : > { %s5095_s27 = smov (!%p3889_p7), 0  }
 0x25d LB: >> { %v3310_v53 = vld [vmem:[%s5089_s8] sm:$0xf]  ;;  %s3312_s30 = sadd.s32 1, %s5093_s6  ;;  %s3304_s27 = sadd.s32 1, %s5097_s27   ;;  %s5097_s27 = sphi %s5095_s27, %s3304_s27   ;;  %s5093_s6 = sphi %s5091_s6, %s5092_s6   ;;  %s5089_s8 = sphi %s5087_s8, %s3317_s8   ;;  %s5085_s9 = sphi %s5083_s9, %s3318_s9  }
 0x25e   : >> { %3311 = vst [vmem:[%s5085_s9] sm:$0xf] %v3310_v53  ;;  %p3313_p2 = scmp.ge.s32.totalorder %s3312_s30, %s5930_s11  ;;  %p3303_p0 = scmp.ge.s32.totalorder %s3304_s27, %s5930_s11 }
 0x260   : >> { %s5996_s30 = smov (%p3313_p2, %s3312_s30), 0  ;;  %3306 = sbr.rel (!%p3303_p0) target bundleno = 605 (0x25d), region = 166 }
 0x261   : >> { %s3890_s26 = sshll.u32 %s5996_s30, 2  ;;  %s5092_s6 = smov %s5996_s30  }
 0x262   : >> { %s3317_s8 = scalar_lea.vmem %s3298_s15, %s3890_s26 [#allocation10]   ;;  %s3318_s9 = scalar_lea.vmem %s3300_s21, %s3890_s26  }
 0x267 PF: > { %s19_s20 = sadd.s32 1, %s5065_s20   ;;  %s5980_s7 = sld [smem:[#allocation15_spill]] }
 0x268   : > { %p16_p9 = scmp.ge.s32.totalorder %s19_s20, 46   ;;  %s5981_s14 = sld [smem:[#allocation14_spill]] }
 0x269   : > { %s5982_s15 = smov %s5049_s16  ;;  %s5983_s16 = smov %s5053_s17 }
 0x26a   : > { %s5985_s18 = smov %s5061_s19  ;;  %18 = sbr.rel (!%p16_p9) target bundleno = 6 (0x6), region = 177 }
 0x26d   : > { %s5984_s17 = smov %s5980_s7 }
 0x26e   : > { %s5986_s19 = smov %s5981_s14 }
 0x271   :  { %3505 = vsyncpa [#allocation4], 1 }
 0x272   :  { %3507 = vsyncpa [#allocation4 + $0x1], 1 }
 0x273   :  { %3508 = vsyncpa [#allocation6], 1 }
 0x274   :  { %3509 = vsyncpa [#allocation9], 1 }

</bundles_post_ra>
